<compile_context>
chip_gen: v7x
topology: tpu7x:2x2x1
jax: 0.10.0
libtpu: 0.0.40
codegen_flags: <defaults>
</compile_context>

<pallas_src>
import math
from functools import partial

import jax
import jax.numpy as jnp
from jax import lax
from jax.experimental import pallas as pl
from jax.experimental.pallas import tpu as pltpu

# ---------------- configuration (mirrors FourierKANConvNDLayer.__init__) -------
INPUT_DIM = 4          # input_dim
OUTPUT_DIM = 8         # output_dim
GROUPS = 2             # groups
GRID_SIZE = 3          # grid_size
KERNEL_SIZE = 3        # kernel_size
PADDING = 1            # padding
STRIDE = 1             # stride    (kernel written for stride=1)
DILATION = 1           # dilation  (kernel written for dilation=1)
EPS = 1e-5             # nn.InstanceNorm2d default eps, affine=False

CIN_G = INPUT_DIM // GROUPS                      # 2
COUT_G = OUTPUT_DIM // GROUPS                    # 4
FIN_G = CIN_G * 2 * GRID_SIZE                    # 12
KH = KW = KERNEL_SIZE
KHW = KH * KW                                    # 9
F_ROWS = INPUT_DIM * (1 + 2 * GRID_SIZE)         # 28 fused feature rows (both groups)
K_TAP = ((F_ROWS + 7) // 8) * 8                  # 32: zero-padded -> tile aligned

_SQRT2 = math.sqrt(2.0)


def _round_up(a, b):
    return ((a + b - 1) // b) * b


def _gelu_exact(x):
    # nn.GELU() default = exact (erf) variant; GELU(0) = 0 preserves zero padding
    return 0.5 * x * (1.0 + lax.erf(x / _SQRT2))


# -------------------------------- Pallas kernel --------------------------------
def _fourier_kan_kernel(H, W, Wp, SEG, prelu_ref, x_ref, w_ref, o_ref):
    slab = x_ref[0]                                    # (8, LTOT) f32, one sample
    x4 = slab[0:INPUT_DIM]                             # all input channels (4, LTOT)
    cmask = slab[INPUT_DIM:INPUT_DIM + 1]              # 1.0 at interior input pixels
    vmask = slab[INPUT_DIM + 1:INPUT_DIM + 2, :SEG]    # 1.0 at valid output lanes

    # ---- features in f32: [gelu | cos(kx)*m k=1..G | sin(kx)*m k=1..G] --------
    g4 = _gelu_exact(x4)                               # gelu(0)=0: pads stay zero
    c1 = jnp.cos(x4) * cmask                           # cos(0)=1 at pads -> mask
    s1 = jnp.sin(x4) * cmask                           # sin(0)=0: mask is harmless
    cos_l, sin_l = [c1], [s1]
    cprev, sprev = cmask, jnp.zeros_like(s1)           # masked cos(0*x), sin(0*x)
    for _ in range(GRID_SIZE - 1):                     # angle-addition recurrence
        cnext = 2.0 * c1 * cos_l[-1] - cprev           # (EUP -> VALU, mask-safe
        snext = 2.0 * c1 * sin_l[-1] - sprev           #  since cmask is 0/1)
        cprev, sprev = cos_l[-1], sin_l[-1]
        cos_l.append(cnext)
        sin_l.append(snext)

    pieces = [g4] + cos_l + sin_l
    if K_TAP > F_ROWS:
        pieces.append(jnp.zeros((K_TAP - F_ROWS, x4.shape[1]), x4.dtype))
    # bf16 only at the MXU boundary (default dot precision truncates anyway).
    feat = jnp.concatenate(pieces, axis=0).astype(jnp.bfloat16)     # (K_TAP, LTOT)

    # ---- fused base+Fourier conv, both groups: 9 accumulated per-tap matmuls --
    acc = jnp.zeros((OUTPUT_DIM, SEG), jnp.float32)
    for kh in range(KH):
        for kw in range(KW):
            off = kh * Wp + kw                         # static lane shift per tap
            acc = acc + jnp.dot(w_ref[kh * KW + kw], feat[:, off:off + SEG],
                                preferred_element_type=jnp.float32)

    # ---- InstanceNorm2d (affine=False) per channel over the H*W valid lanes ---
    inv_n = 1.0 / float(H * W)
    mean = jnp.sum(acc * vmask, axis=1, keepdims=True) * inv_n
    cen = (acc - mean) * vmask
    var = jnp.sum(cen * cen, axis=1, keepdims=True) * inv_n
    y = cen * lax.rsqrt(var + EPS)

    # ---- PReLU (one alpha per group: rows 0-3 -> group 0, rows 4-7 -> group 1)
    row = lax.broadcasted_iota(jnp.int32, (OUTPUT_DIM, 1), 0)
    alpha = jnp.where(row < COUT_G, prelu_ref[0], prelu_ref[1])
    o_ref[0] = jnp.where(y >= 0.0, y, alpha * y)       # single lane-dense store


# ----------------------------- weight pre-packing -------------------------------
def _pack_weights(base_w, four_w):
    """Pack base+fourier conv weights of BOTH groups into one block-diagonal
    (KHW, OUTPUT_DIM, K_TAP) bf16 tensor matching the in-kernel feature rows:
    rows [0, C) gelu, rows C*(1+j) + channel for j = 0..2G-1 (cos1..G, sin1..G)."""
    f32 = jnp.float32
    eye = jnp.eye(GROUPS, dtype=f32)

    bw = jnp.transpose(base_w.astype(f32), (3, 4, 0, 1, 2))            # (KH,KW,G,O,C)
    bw = bw.reshape(KHW, GROUPS, COUT_G, CIN_G)                        # (t,g,o,c)
    base_blk = jnp.einsum('tgoc,gh->tgohc', bw, eye)                   # block-diag
    base_blk = base_blk.reshape(KHW, OUTPUT_DIM, GROUPS * CIN_G)       # (t, 8, 4)

    fw = four_w.astype(f32).reshape(GROUPS, COUT_G, CIN_G, 2 * GRID_SIZE, KH, KW)
    fw = jnp.transpose(fw, (4, 5, 0, 1, 3, 2))                         # (KH,KW,g,o,j,c)
    fw = fw.reshape(KHW, GROUPS, COUT_G, 2 * GRID_SIZE, CIN_G)
    four_blk = jnp.einsum('tgojc,gh->tgojhc', fw, eye)                 # block-diag
    four_blk = four_blk.reshape(KHW, OUTPUT_DIM, 2 * GRID_SIZE * GROUPS * CIN_G)

    pad = jnp.zeros((KHW, OUTPUT_DIM, K_TAP - F_ROWS), f32)
    return jnp.concatenate([base_blk, four_blk, pad], axis=2).astype(jnp.bfloat16)


# -------------------------------- wrapper ---------------------------------------
def fourier_kan_conv2d(x, base_w, four_w, prelu_a):
    """x: (B, INPUT_DIM, H, W) NCHW.  Returns (B, OUTPUT_DIM, H, W) NCHW."""
    B, C, H, W = x.shape
    assert C == INPUT_DIM and STRIDE == 1 and DILATION == 1
    Hp, Wp = H + 2 * PADDING, W + 2 * PADDING
    SEG = _round_up(Hp * Wp, 128)                    # per-sample output lane width
    max_off = (KH - 1) * Wp + (KW - 1)               # largest tap lane shift
    LTOT = SEG + _round_up(max_off, 128)             # per-sample input lane width
    assert SEG >= Hp * Wp and LTOT >= SEG + max_off  # taps never read past the slab
    NROWS = _round_up(C + 2, 8)                      # channels + 2 mask rows, 8-aligned

    # per-sample slab: rows [0,C) zero-padded input channels, row C cos-mask,
    # row C+1 valid-output mask, remaining rows zero. One fat DMA per grid step.
    xp = jnp.pad(x, ((0, 0), (0, 0), (PADDING, PADDING), (PADDING, PADDING)))
    xf = xp.reshape(B, C, Hp * Wp)
    xf = jnp.pad(xf, ((0, 0), (0, 0), (0, LTOT - Hp * Wp)))

    p = jnp.arange(LTOT)
    r, q = p // Wp, p % Wp
    inside = p < Hp * Wp
    cmask = (inside & (r >= PADDING) & (r < PADDING + H)
             & (q >= PADDING) & (q < PADDING + W)).astype(jnp.float32)
    vmask = (inside & (r < H) & (q < W)).astype(jnp.float32)
    extra = jnp.concatenate(
        [cmask[None], vmask[None],
         jnp.zeros((NROWS - C - 2, LTOT), jnp.float32)], axis=0)
    slab = jnp.concatenate([xf, jnp.broadcast_to(extra, (B, NROWS - C, LTOT))],
                           axis=1)                    # (B, NROWS=8, LTOT)

    w_full = _pack_weights(base_w, four_w)            # (9, 8, K_TAP) bf16

    kernel = partial(_fourier_kan_kernel, H, W, Wp, SEG)
    out = pl.pallas_call(
        kernel,
        out_shape=jax.ShapeDtypeStruct((B, OUTPUT_DIM, SEG), jnp.float32),
        grid_spec=pltpu.PrefetchScalarGridSpec(
            num_scalar_prefetch=0,
            grid=(B,),                                # one sample per step; >=2-way
            in_specs=[                                # parallel axis for v7x's 2 TCs
                pl.BlockSpec(memory_space=pltpu.MemorySpace.SMEM),            # prelu
                pl.BlockSpec((1, NROWS, LTOT), lambda b: (b, 0, 0)),          # slab
                pl.BlockSpec((KHW, OUTPUT_DIM, K_TAP), lambda b: (0, 0, 0)),  # weights
            ],
            out_specs=pl.BlockSpec((1, OUTPUT_DIM, SEG), lambda b: (b, 0, 0)),
        ),
        compiler_params=pltpu.CompilerParams(
            dimension_semantics=("parallel",)),
        # NOTE: when scaling H/W/B add a spatial grid axis + vmem_limit_bytes
        # (v7x has 64 MiB VMEM vs 128 MiB on v5e/v6e); not needed at this size.
    )(prelu_a, slab, w_full)

    # valid output (h, w) sits at lane h*Wp + w of each sample's segment.
    out = out[..., :Hp * Wp].reshape(B, OUTPUT_DIM, Hp, Wp)[..., :H, :W]
    return out


# ----------------------- deterministic parameter init ---------------------------
def init_params(key):
    kb, kf = jax.random.split(key)
    # kaiming_uniform_ with nonlinearity='linear' -> gain=1, bound=sqrt(3/fan_in)
    bound_b = math.sqrt(3.0 / (CIN_G * KH * KW))
    bound_f = math.sqrt(3.0 / (FIN_G * KH * KW))
    base_w = jax.random.uniform(kb, (GROUPS, COUT_G, CIN_G, KH, KW),
                                jnp.float32, -bound_b, bound_b)
    four_w = jax.random.uniform(kf, (GROUPS, COUT_G, FIN_G, KH, KW),
                                jnp.float32, -bound_f, bound_f)
    prelu_a = jnp.full((GROUPS,), 0.25, jnp.float32)     # nn.PReLU default init
    return base_w, four_w, prelu_a


# ---------------------------- pure-JAX reference --------------------------------
def reference_forward(x, base_w, four_w, prelu_a):
    B, _, H, W = x.shape
    dn = ('NCHW', 'OIHW', 'NCHW')
    outs = []
    for g in range(GROUPS):
        xg = x[:, g * CIN_G:(g + 1) * CIN_G]
        xb = 0.5 * xg * (1.0 + lax.erf(xg / _SQRT2))
        base_out = lax.conv_general_dilated(
            xb, base_w[g], (STRIDE, STRIDE), [(PADDING, PADDING)] * 2,
            dimension_numbers=dn)
        k = jnp.arange(1, GRID_SIZE + 1, dtype=x.dtype).reshape(1, 1, GRID_SIZE, 1, 1)
        kx = k * xg[:, :, None]
        feats = jnp.concatenate([jnp.cos(kx), jnp.sin(kx)], axis=2)
        feats = feats.reshape(B, CIN_G * 2 * GRID_SIZE, H, W)
        four_out = lax.conv_general_dilated(
            feats, four_w[g], (STRIDE, STRIDE), [(PADDING, PADDING)] * 2,
            dimension_numbers=dn)
        comb = base_out + four_out
        mean = comb.mean(axis=(2, 3), keepdims=True)
        var = ((comb - mean) ** 2).mean(axis=(2, 3), keepdims=True)
        y = (comb - mean) / jnp.sqrt(var + EPS)
        y = jnp.where(y >= 0, y, prelu_a[g] * y)
        outs.append(y)
    return jnp.concatenate(outs, axis=1)


if __name__ == "__main__":
    key = jax.random.PRNGKey(0)
    kx, kp = jax.random.split(key)

    B, H, W = 2, 16, 16
    x = jax.random.normal(kx, (B, INPUT_DIM, H, W), jnp.float32)
    base_w, four_w, prelu_a = init_params(kp)

    out = fourier_kan_conv2d(x, base_w, four_w, prelu_a)
    out = jax.block_until_ready(out)
    assert out.shape == (B, OUTPUT_DIM, H, W)

    ref = reference_forward(x, base_w, four_w, prelu_a)
    max_err = float(jnp.max(jnp.abs(out - ref)))
    if max_err > 2e-2:
        raise AssertionError(f"Pallas kernel mismatch vs reference: {max_err}")

    print("KERNEL_OK")
</pallas_src>

<mosaic_0001>
module attributes {stable_mosaic.version = 11 : i64} {
  func.func @_fourier_kan_kernel(%arg0: i32, %arg1: memref<2xf32, #tpu.memory_space<smem>>, %arg2: memref<1x8x512xf32, #tpu.memory_space<vmem>>, %arg3: memref<9x8x32xbf16, #tpu.memory_space<vmem>>, %arg4: memref<1x8x384xf32, #tpu.memory_space<vmem>>) attributes {dimension_semantics = [#tpu.dimension_semantics<parallel>], iteration_bounds = array<i64: 2>, scalar_prefetch = 0 : i64, scratch_operands = 0 : i64, tpu.core_type = #tpu.core_type<tc>, window_params = [{transform_indices = @transform_0, window_bounds = array<i64: 2>}, {transform_indices = @transform_1, window_bounds = array<i64: 1, 8, 512>}, {pipeline_mode = #tpu.pipeline_mode<synchronous>, transform_indices = @transform_2, window_bounds = array<i64: 9, 8, 32>}, {transform_indices = @transform_3, window_bounds = array<i64: 1, 8, 384>}]} {
    %c0 = arith.constant 0 : index
    %c0_0 = arith.constant 0 : index
    %c0_1 = arith.constant 0 : index
    %0 = vector.load %arg2[%c0, %c0_0, %c0_1] : memref<1x8x512xf32, #tpu.memory_space<vmem>>, vector<1x8x512xf32>
    %1 = vector.shape_cast %0 : vector<1x8x512xf32> to vector<8x512xf32>
    %2 = vector.extract_strided_slice %1 {offsets = [0, 0], sizes = [4, 512], strides = [1, 1]} : vector<8x512xf32> to vector<4x512xf32>
    %3 = vector.extract_strided_slice %1 {offsets = [4, 0], sizes = [1, 512], strides = [1, 1]} : vector<8x512xf32> to vector<1x512xf32>
    %4 = vector.extract_strided_slice %1 {offsets = [5, 0], sizes = [1, 384], strides = [1, 1]} : vector<8x512xf32> to vector<1x384xf32>
    %cst = arith.constant 5.000000e-01 : f32
    %5 = vector.broadcast %cst : f32 to vector<4x512xf32>
    %6 = arith.mulf %5, %2 : vector<4x512xf32>
    %cst_2 = arith.constant 1.41421354 : f32
    %7 = vector.broadcast %cst_2 : f32 to vector<4x512xf32>
    %8 = arith.divf %2, %7 : vector<4x512xf32>
    %9 = math.erf %8 : vector<4x512xf32>
    %cst_3 = arith.constant 1.000000e+00 : f32
    %10 = vector.broadcast %cst_3 : f32 to vector<4x512xf32>
    %11 = arith.addf %10, %9 : vector<4x512xf32>
    %12 = arith.mulf %6, %11 : vector<4x512xf32>
    %13 = math.cos %2 : vector<4x512xf32>
    %14 = vector.broadcast %3 : vector<1x512xf32> to vector<4x512xf32>
    %15 = arith.mulf %13, %14 : vector<4x512xf32>
    %16 = math.sin %2 : vector<4x512xf32>
    %17 = vector.broadcast %3 : vector<1x512xf32> to vector<4x512xf32>
    %18 = arith.mulf %16, %17 : vector<4x512xf32>
    %cst_4 = arith.constant 0.000000e+00 : f32
    %19 = vector.broadcast %cst_4 : f32 to vector<4x512xf32>
    %cst_5 = arith.constant 2.000000e+00 : f32
    %20 = vector.broadcast %cst_5 : f32 to vector<4x512xf32>
    %21 = arith.mulf %20, %15 : vector<4x512xf32>
    %22 = arith.mulf %21, %15 : vector<4x512xf32>
    %23 = vector.broadcast %3 : vector<1x512xf32> to vector<4x512xf32>
    %24 = arith.subf %22, %23 : vector<4x512xf32>
    %cst_6 = arith.constant 2.000000e+00 : f32
    %25 = vector.broadcast %cst_6 : f32 to vector<4x512xf32>
    %26 = arith.mulf %25, %15 : vector<4x512xf32>
    %27 = arith.mulf %26, %18 : vector<4x512xf32>
    %28 = arith.subf %27, %19 : vector<4x512xf32>
    %cst_7 = arith.constant 2.000000e+00 : f32
    %29 = vector.broadcast %cst_7 : f32 to vector<4x512xf32>
    %30 = arith.mulf %29, %15 : vector<4x512xf32>
    %31 = arith.mulf %30, %24 : vector<4x512xf32>
    %32 = arith.subf %31, %15 : vector<4x512xf32>
    %cst_8 = arith.constant 2.000000e+00 : f32
    %33 = vector.broadcast %cst_8 : f32 to vector<4x512xf32>
    %34 = arith.mulf %33, %15 : vector<4x512xf32>
    %35 = arith.mulf %34, %28 : vector<4x512xf32>
    %36 = arith.subf %35, %18 : vector<4x512xf32>
    %cst_9 = arith.constant 0.000000e+00 : f32
    %37 = vector.broadcast %cst_9 : f32 to vector<4x512xf32>
    %38 = tpu.concatenate %12, %15, %24, %32, %18, %28, %36, %37 in 0 : vector<4x512xf32>, vector<4x512xf32>, vector<4x512xf32>, vector<4x512xf32>, vector<4x512xf32>, vector<4x512xf32>, vector<4x512xf32>, vector<4x512xf32> -> vector<32x512xf32>
    %39 = arith.truncf %38 : vector<32x512xf32> to vector<32x512xbf16>
    %cst_10 = arith.constant 0.000000e+00 : f32
    %40 = vector.broadcast %cst_10 : f32 to vector<8x384xf32>
    %c0_11 = arith.constant 0 : index
    %c0_12 = arith.constant 0 : index
    %c0_13 = arith.constant 0 : index
    %41 = vector.load %arg3[%c0_11, %c0_12, %c0_13] : memref<9x8x32xbf16, #tpu.memory_space<vmem>>, vector<1x8x32xbf16>
    %42 = vector.shape_cast %41 : vector<1x8x32xbf16> to vector<8x32xbf16>
    %43 = vector.extract_strided_slice %39 {offsets = [0, 0], sizes = [32, 384], strides = [1, 1]} : vector<32x512xbf16> to vector<32x384xbf16>
    %cst_14 = arith.constant dense<0.000000e+00> : vector<8x384xf32>
    %44 = tpu.matmul %42, %43, %cst_14 {dimension_numbers = #tpu.dot_dimension_numbers<[1], [0], [0], [1], [0, 0, 1, 1], [], []>} : vector<8x32xbf16>, vector<32x384xbf16>, vector<8x384xf32> -> vector<8x384xf32>
    %45 = arith.addf %40, %44 : vector<8x384xf32>
    %c1 = arith.constant 1 : index
    %c0_15 = arith.constant 0 : index
    %c0_16 = arith.constant 0 : index
    %46 = vector.load %arg3[%c1, %c0_15, %c0_16] : memref<9x8x32xbf16, #tpu.memory_space<vmem>>, vector<1x8x32xbf16>
    %47 = vector.shape_cast %46 : vector<1x8x32xbf16> to vector<8x32xbf16>
    %48 = vector.extract_strided_slice %39 {offsets = [0, 1], sizes = [32, 384], strides = [1, 1]} : vector<32x512xbf16> to vector<32x384xbf16>
    %cst_17 = arith.constant dense<0.000000e+00> : vector<8x384xf32>
    %49 = tpu.matmul %47, %48, %cst_17 {dimension_numbers = #tpu.dot_dimension_numbers<[1], [0], [0], [1], [0, 0, 1, 1], [], []>} : vector<8x32xbf16>, vector<32x384xbf16>, vector<8x384xf32> -> vector<8x384xf32>
    %50 = arith.addf %45, %49 : vector<8x384xf32>
    %c2 = arith.constant 2 : index
    %c0_18 = arith.constant 0 : index
    %c0_19 = arith.constant 0 : index
    %51 = vector.load %arg3[%c2, %c0_18, %c0_19] : memref<9x8x32xbf16, #tpu.memory_space<vmem>>, vector<1x8x32xbf16>
    %52 = vector.shape_cast %51 : vector<1x8x32xbf16> to vector<8x32xbf16>
    %53 = vector.extract_strided_slice %39 {offsets = [0, 2], sizes = [32, 384], strides = [1, 1]} : vector<32x512xbf16> to vector<32x384xbf16>
    %cst_20 = arith.constant dense<0.000000e+00> : vector<8x384xf32>
    %54 = tpu.matmul %52, %53, %cst_20 {dimension_numbers = #tpu.dot_dimension_numbers<[1], [0], [0], [1], [0, 0, 1, 1], [], []>} : vector<8x32xbf16>, vector<32x384xbf16>, vector<8x384xf32> -> vector<8x384xf32>
    %55 = arith.addf %50, %54 : vector<8x384xf32>
    %c3 = arith.constant 3 : index
    %c0_21 = arith.constant 0 : index
    %c0_22 = arith.constant 0 : index
    %56 = vector.load %arg3[%c3, %c0_21, %c0_22] : memref<9x8x32xbf16, #tpu.memory_space<vmem>>, vector<1x8x32xbf16>
    %57 = vector.shape_cast %56 : vector<1x8x32xbf16> to vector<8x32xbf16>
    %58 = vector.extract_strided_slice %39 {offsets = [0, 18], sizes = [32, 384], strides = [1, 1]} : vector<32x512xbf16> to vector<32x384xbf16>
    %cst_23 = arith.constant dense<0.000000e+00> : vector<8x384xf32>
    %59 = tpu.matmul %57, %58, %cst_23 {dimension_numbers = #tpu.dot_dimension_numbers<[1], [0], [0], [1], [0, 0, 1, 1], [], []>} : vector<8x32xbf16>, vector<32x384xbf16>, vector<8x384xf32> -> vector<8x384xf32>
    %60 = arith.addf %55, %59 : vector<8x384xf32>
    %c4 = arith.constant 4 : index
    %c0_24 = arith.constant 0 : index
    %c0_25 = arith.constant 0 : index
    %61 = vector.load %arg3[%c4, %c0_24, %c0_25] : memref<9x8x32xbf16, #tpu.memory_space<vmem>>, vector<1x8x32xbf16>
    %62 = vector.shape_cast %61 : vector<1x8x32xbf16> to vector<8x32xbf16>
    %63 = vector.extract_strided_slice %39 {offsets = [0, 19], sizes = [32, 384], strides = [1, 1]} : vector<32x512xbf16> to vector<32x384xbf16>
    %cst_26 = arith.constant dense<0.000000e+00> : vector<8x384xf32>
    %64 = tpu.matmul %62, %63, %cst_26 {dimension_numbers = #tpu.dot_dimension_numbers<[1], [0], [0], [1], [0, 0, 1, 1], [], []>} : vector<8x32xbf16>, vector<32x384xbf16>, vector<8x384xf32> -> vector<8x384xf32>
    %65 = arith.addf %60, %64 : vector<8x384xf32>
    %c5 = arith.constant 5 : index
    %c0_27 = arith.constant 0 : index
    %c0_28 = arith.constant 0 : index
    %66 = vector.load %arg3[%c5, %c0_27, %c0_28] : memref<9x8x32xbf16, #tpu.memory_space<vmem>>, vector<1x8x32xbf16>
    %67 = vector.shape_cast %66 : vector<1x8x32xbf16> to vector<8x32xbf16>
    %68 = vector.extract_strided_slice %39 {offsets = [0, 20], sizes = [32, 384], strides = [1, 1]} : vector<32x512xbf16> to vector<32x384xbf16>
    %cst_29 = arith.constant dense<0.000000e+00> : vector<8x384xf32>
    %69 = tpu.matmul %67, %68, %cst_29 {dimension_numbers = #tpu.dot_dimension_numbers<[1], [0], [0], [1], [0, 0, 1, 1], [], []>} : vector<8x32xbf16>, vector<32x384xbf16>, vector<8x384xf32> -> vector<8x384xf32>
    %70 = arith.addf %65, %69 : vector<8x384xf32>
    %c6 = arith.constant 6 : index
    %c0_30 = arith.constant 0 : index
    %c0_31 = arith.constant 0 : index
    %71 = vector.load %arg3[%c6, %c0_30, %c0_31] : memref<9x8x32xbf16, #tpu.memory_space<vmem>>, vector<1x8x32xbf16>
    %72 = vector.shape_cast %71 : vector<1x8x32xbf16> to vector<8x32xbf16>
    %73 = vector.extract_strided_slice %39 {offsets = [0, 36], sizes = [32, 384], strides = [1, 1]} : vector<32x512xbf16> to vector<32x384xbf16>
    %cst_32 = arith.constant dense<0.000000e+00> : vector<8x384xf32>
    %74 = tpu.matmul %72, %73, %cst_32 {dimension_numbers = #tpu.dot_dimension_numbers<[1], [0], [0], [1], [0, 0, 1, 1], [], []>} : vector<8x32xbf16>, vector<32x384xbf16>, vector<8x384xf32> -> vector<8x384xf32>
    %75 = arith.addf %70, %74 : vector<8x384xf32>
    %c7 = arith.constant 7 : index
    %c0_33 = arith.constant 0 : index
    %c0_34 = arith.constant 0 : index
    %76 = vector.load %arg3[%c7, %c0_33, %c0_34] : memref<9x8x32xbf16, #tpu.memory_space<vmem>>, vector<1x8x32xbf16>
    %77 = vector.shape_cast %76 : vector<1x8x32xbf16> to vector<8x32xbf16>
    %78 = vector.extract_strided_slice %39 {offsets = [0, 37], sizes = [32, 384], strides = [1, 1]} : vector<32x512xbf16> to vector<32x384xbf16>
    %cst_35 = arith.constant dense<0.000000e+00> : vector<8x384xf32>
    %79 = tpu.matmul %77, %78, %cst_35 {dimension_numbers = #tpu.dot_dimension_numbers<[1], [0], [0], [1], [0, 0, 1, 1], [], []>} : vector<8x32xbf16>, vector<32x384xbf16>, vector<8x384xf32> -> vector<8x384xf32>
    %80 = arith.addf %75, %79 : vector<8x384xf32>
    %c8 = arith.constant 8 : index
    %c0_36 = arith.constant 0 : index
    %c0_37 = arith.constant 0 : index
    %81 = vector.load %arg3[%c8, %c0_36, %c0_37] : memref<9x8x32xbf16, #tpu.memory_space<vmem>>, vector<1x8x32xbf16>
    %82 = vector.shape_cast %81 : vector<1x8x32xbf16> to vector<8x32xbf16>
    %83 = vector.extract_strided_slice %39 {offsets = [0, 38], sizes = [32, 384], strides = [1, 1]} : vector<32x512xbf16> to vector<32x384xbf16>
    %cst_38 = arith.constant dense<0.000000e+00> : vector<8x384xf32>
    %84 = tpu.matmul %82, %83, %cst_38 {dimension_numbers = #tpu.dot_dimension_numbers<[1], [0], [0], [1], [0, 0, 1, 1], [], []>} : vector<8x32xbf16>, vector<32x384xbf16>, vector<8x384xf32> -> vector<8x384xf32>
    %85 = arith.addf %80, %84 : vector<8x384xf32>
    %86 = vector.broadcast %4 : vector<1x384xf32> to vector<8x384xf32>
    %87 = arith.mulf %85, %86 : vector<8x384xf32>
    %cst_39 = arith.constant dense<0.000000e+00> : vector<8xf32>
    %88 = vector.multi_reduction <add>, %87, %cst_39 [1] : vector<8x384xf32> to vector<8xf32>
    %89 = vector.shape_cast %88 : vector<8xf32> to vector<8x1xf32>
    %cst_40 = arith.constant 3.906250e-03 : f32
    %90 = vector.broadcast %cst_40 : f32 to vector<8x1xf32>
    %91 = arith.mulf %89, %90 : vector<8x1xf32>
    %92 = vector.broadcast %91 : vector<8x1xf32> to vector<8x384xf32>
    %93 = arith.subf %85, %92 : vector<8x384xf32>
    %94 = vector.broadcast %4 : vector<1x384xf32> to vector<8x384xf32>
    %95 = arith.mulf %93, %94 : vector<8x384xf32>
    %96 = arith.mulf %95, %95 : vector<8x384xf32>
    %cst_41 = arith.constant dense<0.000000e+00> : vector<8xf32>
    %97 = vector.multi_reduction <add>, %96, %cst_41 [1] : vector<8x384xf32> to vector<8xf32>
    %98 = vector.shape_cast %97 : vector<8xf32> to vector<8x1xf32>
    %cst_42 = arith.constant 3.906250e-03 : f32
    %99 = vector.broadcast %cst_42 : f32 to vector<8x1xf32>
    %100 = arith.mulf %98, %99 : vector<8x1xf32>
    %cst_43 = arith.constant 9.99999974E-6 : f32
    %101 = vector.broadcast %cst_43 : f32 to vector<8x1xf32>
    %102 = arith.addf %100, %101 : vector<8x1xf32>
    %103 = math.rsqrt %102 : vector<8x1xf32>
    %104 = vector.broadcast %103 : vector<8x1xf32> to vector<8x384xf32>
    %105 = arith.mulf %95, %104 : vector<8x384xf32>
    %106 = tpu.iota {dimensions = array<i32: 0>} : vector<8x1xi32>
    %c4_i32 = arith.constant 4 : i32
    %107 = vector.broadcast %c4_i32 : i32 to vector<8x1xi32>
    %108 = arith.cmpi slt, %106, %107 : vector<8x1xi32>
    %c0_44 = arith.constant 0 : index
    %109 = memref.load %arg1[%c0_44] : memref<2xf32, #tpu.memory_space<smem>>
    %c1_45 = arith.constant 1 : index
    %110 = memref.load %arg1[%c1_45] : memref<2xf32, #tpu.memory_space<smem>>
    %111 = vector.broadcast %109 : f32 to vector<8x1xf32>
    %112 = vector.broadcast %110 : f32 to vector<8x1xf32>
    %113 = arith.select %108, %111, %112 : vector<8x1xi1>, vector<8x1xf32>
    %cst_46 = arith.constant 0.000000e+00 : f32
    %114 = vector.broadcast %cst_46 : f32 to vector<8x384xf32>
    %115 = arith.cmpf oge, %105, %114 : vector<8x384xf32>
    %116 = vector.broadcast %113 : vector<8x1xf32> to vector<8x384xf32>
    %117 = arith.mulf %116, %105 : vector<8x384xf32>
    %118 = arith.select %115, %105, %117 : vector<8x384xi1>, vector<8x384xf32>
    %c0_47 = arith.constant 0 : index
    %c0_48 = arith.constant 0 : index
    %c0_49 = arith.constant 0 : index
    %119 = vector.load %arg4[%c0_47, %c0_48, %c0_49] : memref<1x8x384xf32, #tpu.memory_space<vmem>>, vector<1x8x384xf32>
    %120 = vector.shape_cast %119 : vector<1x8x384xf32> to vector<8x384xf32>
    %121 = vector.shape_cast %118 : vector<8x384xf32> to vector<1x8x384xf32>
    tpu.vector_store %arg4[%c0_47, %c0_48, %c0_49], %121 {strides = array<i32>} : memref<1x8x384xf32, #tpu.memory_space<vmem>>, vector<1x8x384xf32>,
    return
  }
  func.func @transform_0(%arg0: i32) -> i32 {
    %c0_i32 = arith.constant 0 : i32
    %c0_i32_0 = arith.constant 0 : i32
    return %c0_i32 : i32
  }
  func.func @transform_1(%arg0: i32) -> (i32, i32, i32) {
    %c0_i32 = arith.constant 0 : i32
    %c0_i32_0 = arith.constant 0 : i32
    %c0_i32_1 = arith.constant 0 : i32
    return %arg0, %c0_i32, %c0_i32_0 : i32, i32, i32
  }
  func.func @transform_2(%arg0: i32) -> (i32, i32, i32) {
    %c0_i32 = arith.constant 0 : i32
    %c0_i32_0 = arith.constant 0 : i32
    %c0_i32_1 = arith.constant 0 : i32
    %c0_i32_2 = arith.constant 0 : i32
    return %c0_i32, %c0_i32_0, %c0_i32_1 : i32, i32, i32
  }
  func.func @transform_3(%arg0: i32) -> (i32, i32, i32) {
    %c0_i32 = arith.constant 0 : i32
    %c0_i32_0 = arith.constant 0 : i32
    %c0_i32_1 = arith.constant 0 : i32
    return %arg0, %c0_i32, %c0_i32_0 : i32, i32, i32
  }
}

</mosaic_0001>

<bundles_post_ra>
// kernel: tpu_custom_call.1
= control target key start
LH: loop header
LB: loop body
LE: loop exit
PB: predicated region body
PF: predicated region fallthrough
CT: control target
= control target key end

     0   :  { %8 = vsyncpa [#allocation5], 0  ;;  %s3922_s0 = inlined_call_operand.hbm [shape: f32[2], index: 0, kind: input, shape index: {}]   ;;  %s3923_s1 = inlined_call_operand.hbm [shape: f32[2,8,512], index: 1, kind: input, shape index: {}]   ;;  %s3924_s2 = inlined_call_operand.hbm [shape: bf16[9,8,32], index: 2, kind: input, shape index: {}]   ;;  %s3925_s3 = inlined_call_operand.hbm [shape: f32[2,8,384], index: 3, kind: output, shape index: {}]  }
   0x1   :  { %9 = vsyncpa [#allocation3], 0 }
   0x2   :  { %11 = vsyncpa [#allocation3 + $0x1], 0 }
   0x3   :  { %12 = vsyncpa [#allocation8], 0 }
   0x4   :  { %13 = vsyncpa [#allocation4], 0 }
   0x5   :  { %15 = vsyncpa [#allocation4 + $0x1], 0  ;;  %s2951_s12 = smov 0   ;;  %s2953_s13 = smov 0  }
   0x6   :  { %s2955_s14 = smov 0   ;;  %s2957_s15 = smov 0  }
   0x7 LB: > { %s2972_s16 = sadd.s32 4294967295, %s2905_s15   ;;  %s2386_s17 = sadd.s32 4294967294, %s2905_s15   ;;  %s2905_s15 = sphi %s2957_s15, %s3953_s15   ;;  %s2901_s14 = sphi %s2955_s14, %s3952_s14   ;;  %s2897_s13 = sphi %s2953_s13, %s3951_s13   ;;  %s2893_s12 = sphi %s2951_s12, %s3950_s12  }
   0x8   : > { %p62_p0 = scmp.ne.s32.totalorder %s2897_s13, %s2893_s12  ;;  %p3926_p1 = scmp.eq.s32.totalorder %s2972_s16, 0 }
   0x9   : > { %p113_p3 = scmp.eq.s32.totalorder %s2386_s17, 1  ;;  %p2387_p5 = scmp.ge.s32.totalorder %s2905_s15, 1 }
   0xa   : > { %p2981_p4 = por %p3926_p1, %p62_p0  ;;  %p120_p7 = scmp.lt.s32.totalorder %s2905_s15, 3 }
   0xb   : > { %p2986_p6 = por %p113_p3, %p62_p0  ;;  %s2907_s21 = smov [#allocation7]  }
   0xc   : > { %s3929_s18 = scalar_select %p2981_p4, 1, 0 }
   0xd   : > { %s3930_s19 = scalar_select %p2986_p6, 1, 0 }
   0xe   : > { %p2991_p8 = pnand %p2387_p5, %p120_p7  ;;  %s141_s22 = sshll.u32 %s2907_s21, 4  ;;  %s2998_s22 = int_to_ptr.vmem [resolvable:$true] %s141_s22 }
   0xf   : > { %s3007_s24 = sadd.s32 1, %s2905_s15   ;;  %s2760_s28 = scalar_lea.hbm %s3922_s0, 16 }
  0x10   : > { %p2655_p10 = pneg %p2991_p8  ;;  %s46_s25 = ssub.s32 %s2905_s15, %s3007_s24 }
  0x11   : > { %p2761_p12 = scmp.ne.s32.totalorder %s3922_s0, %s2760_s28  ;;  %p2767_p5 = scmp.lt.u32.totalorder %s2760_s28, %s3922_s0 }
  0x12   : > { %p3002_p11 = pnand %p2655_p10, %p3926_p1 }
  0x14   : > { %p2762_p13 = pneg %p3002_p11 }
  0x16   : > { %p2763_p0 = pnand %p2762_p13, %p2761_p12 }
  0x18   : > { %p2764_p3 = pneg %p2763_p0 }
  0x1a   : > { %p2769_p7 = pnand %p2767_p5, %p2764_p3 }
  0x1c   : > { %2772 = shalt.err (!%p2769_p7)
}
  0x1d   : > { %s2908_s6 = smov [#allocation2]   ;;  %s2773_s11 = scalar_lea.hbm %s3924_s2, 576 }
  0x1e   : > { %2658 = dma.hbm_to_smem (!%p3002_p11), %s3922_s0, 16, %s2908_s6, [#allocation5]  }
  0x1f   : > { %p2774_p10 = scmp.ne.s32.totalorder %s3924_s2, %s2773_s11  ;;  %p2780_p3 = scmp.lt.u32.totalorder %s2773_s11, %s3924_s2 }
  0x21   : > { %p2776_p12 = pnand %p2774_p10, %p2762_p13 }
  0x23   : > { %p2777_p0 = pneg %p2776_p12 }
  0x25   : > { %p2782_p5 = pnand %p2780_p3, %p2777_p0 }
  0x27   : > { %2785 = shalt.err (!%p2782_p5)
}
  0x28   : > { %s2786_s28 = scalar_lea.vmem %s2998_s22, 576  ;;  %p2794_p2 = scmp.lt.s32.totalorder %s2998_s22, %s2998_s22 }
  0x29   : > { %p2787_p7 = scmp.ne.s32.totalorder %s2998_s22, %s2786_s28  ;;  %p2795_p10 = scmp.lt.s32.totalorder %s2786_s28, %s2786_s28 }
  0x2b   : > { %p2789_p9 = pnand %p2787_p7, %p2762_p13  ;;  %p2796_p12 = por %p2795_p10, %p2794_p2 }
  0x2d   : > { %p2790_p1 = pneg %p2789_p9 }
  0x2f   : > { %p2797_p6 = pnand %p2796_p12, %p2790_p1 }
  0x31   : > { %2800 = shalt.err (!%p2797_p6)
}
  0x32   : > { %s2909_s29 = smov 64   ;;  %s2910_s30 = smov 4  }
  0x33   : > { %2661 = dma.hbm_to_vmem [thread:$0]  (!%p3002_p11), %s3924_s2, 576, %s2998_s22, [#allocation8], %s2909_s29, %s2909_s29, %s2910_s30  }
  0x34   : > { %p47_p1 = scmp.eq.s32.totalorder %s46_s25, 0  ;;  %s49_s6 = sadd.s32 1, %s2901_s14 }
  0x35   : > { %p56_p2 = scmp.ne.s32.totalorder %s2901_s14, %s2897_s13  ;;  %p57_p6 = scmp.eq.s32.totalorder %s2905_s15, 0 }
  0x36   : > { %s3063_s7 = scalar_select %p47_p1, %s2901_s14, %s49_s6  }
  0x37   : > { %p58_p9 = por %p57_p6, %p56_p2  ;;  %p3933_p13 = scmp.eq.s32.totalorder %s2972_s16, 1 }
  0x38   : > { %p2672_p3 = scmp.lt.s32.totalorder %s2905_s15, 2  ;;  %s155_s9 = sand.u32 1, %s2901_s14  }
  0x39   : > { %p3067_p0 = por %p3933_p13, %p56_p2  ;;  %s2391_s23 = sshll.u32 %s155_s9, 5 }
  0x3a   : > { %s2461_s10 = sshll.u32 %s2905_s15, 9  ;;  %s159_s25 = scalar_lea.vmem [#allocation6], %s2391_s23 }
  0x3b   : > { %s3934_s8 = scalar_select %p3067_p0, 1, 0 }
  0x3c   : > { %s3077_s22 = scalar_lea.hbm %s3923_s1, %s2461_s10  ;;  %s167_s21 = sshll.u32 %s159_s25, 4  ;;  %s3079_s21 = int_to_ptr.vmem [resolvable:$true] %s167_s21 }
  0x3d   : > { %p3081_p11 = pnand %p2672_p3, %p58_p9  ;;  %s156_s27 = scalar_lea.sflag [#allocation3], %s155_s9 }
  0x3e   : > { %s2801_s28 = scalar_lea.hbm %s3077_s22, 512  ;;  %s2806_s4 = scalar_lea.hbm %s3923_s1, 1024 }
  0x3f   : > { %p2802_p5 = scmp.ne.s32.totalorder %s3077_s22, %s2801_s28  ;;  %p2803_p7 = pneg %p3081_p11 }
  0x40   : > { %p2807_p1 = scmp.lt.u32.totalorder %s3077_s22, %s3923_s1  ;;  %p2808_p2 = scmp.lt.u32.totalorder %s2806_s4, %s2801_s28 }
  0x41   : > { %p2804_p10 = pnand %p2803_p7, %p2802_p5  ;;  %p2810_p9 = scmp.lt.u32.totalorder %s2801_s28, %s3077_s22 }
  0x42   : > { %p2809_p6 = por %p2808_p2, %p2807_p1 }
  0x43   : > { %p2805_p12 = pneg %p2804_p10 }
  0x44   : > { %p2811_p13 = por %p2810_p9, %p2809_p6 }
  0x46   : > { %p2812_p3 = pnand %p2811_p13, %p2805_p12 }
  0x48   : > { %2815 = shalt.err (!%p2812_p3)
}
  0x49   : > { %s2816_s9 = scalar_lea.vmem %s3079_s21, 512  ;;  %s2911_s23 = smov [#allocation6]  }
  0x4a   : > { %p2817_p5 = scmp.ne.s32.totalorder %s3079_s21, %s2816_s9  ;;  %s2821_s10 = sshll.u32 %s2911_s23, 4  ;;  %s2822_s10 = int_to_ptr.vmem [resolvable:$false] %s2821_s10 }
  0x4b   : > { %s2823_s11 = scalar_lea.vmem %s2822_s10, 1024  ;;  %p2824_p4 = scmp.lt.s32.totalorder %s3079_s21, %s2822_s10 }
  0x4c   : > { %p2819_p10 = pnand %p2817_p5, %p2803_p7  ;;  %p2825_p1 = scmp.lt.s32.totalorder %s2823_s11, %s2816_s9 }
  0x4e   : > { %p2820_p0 = pneg %p2819_p10  ;;  %p2826_p2 = por %p2825_p1, %p2824_p4 }
  0x50   : > { %p2827_p6 = pnand %p2826_p2, %p2820_p0 }
  0x52   : > { %2830 = shalt.err (!%p2827_p6)
}
  0x53   : > { %2665 = dma.hbm_to_vmem [thread:$0]  (!%p3081_p11), %s3077_s22, 512, %s3079_s21, %s156_s27  }
  0x54   : > { %176 = sbr.rel (%p2991_p8) target bundleno = 1057 (0x421), region = 32  ;;  %p3936_p7 = scmp.eq.s32.totalorder (!%p2991_p8), %s2972_s16, 0 }
  0x5b   : > { %2876 = dma.done.wait (%p3936_p7), [#allocation5], 16   ;;  %p3937_p12 = pmov %p3936_p7 }
  0x5c   : > { %s3117_s17 = sand.u32 1, %s2897_s13   ;;  %p3938_p4 = scmp.ne.s32.totalorder %s3929_s18, 0 }
  0x5d   : > { %2878 = vsyncadd (%p3937_p12), [#allocation5], 4294967280  ;;  %s2396_s25 = sshll.u32 %s3117_s17, 5  ;;  %s183_s26 = scalar_lea.sflag [#allocation3], %s3117_s17 }
  0x5e   : > { %s3121_s28 = scalar_lea.vmem [#allocation6], %s2396_s25 }
  0x5f   : > { %2880 = dma.done.wait (%p3938_p4), %s183_s26, 512  }
  0x60   : > { %2882 = vsyncadd (%p3938_p4), %s183_s26, 4294966784  ;;  %p3939_p8 = pmov %p3936_p7 }
  0x61   : > { %p3940_p0 = pmov %p3936_p7 }
  0x62   : > { %2884 = dma.done.wait (%p3939_p8), [#allocation8], 576  }
  0x63   : > { %2886 = vsyncadd (%p3940_p0), [#allocation8], 4294966720 }
  0x64   : > { %195 = sfence }
  0x65   : > { %v3132_v0 = vld [vmem:[%s3121_s28 + $0x10] sm:$0xff]  ;;  %v3137_v3 = vld [vmem:[%s3121_s28 + $0x8] sm:$0xff]  ;;  %v3144_v9 = vld [vmem:[%s3121_s28 + $0x18] sm:$0xff]  ;;  %v2912_v25 = vmov 683565275   ;;  %s2918_s18 = smov 127  }
  0x66   : > { %v446_v1 = vand.u32 2147483647, %v3132_v0  ;;  %v449_v2 = vand.u32 2139095040, %v3132_v0  ;;  %v343_v6 = vand.u32 2147483647, %v3137_v3  ;;  %v346_v7 = vand.u32 2139095040, %v3137_v3 }
  0x67   : > { %v552_v16 = vand.u32 2139095040, %v3144_v9  ;;  %v2913_v27 = vmov 2475754826   ;;  %v2914_v29 = vmov 2131351028   ;;  %vm448_vm13 = vcmp.lt.s32.totalorder %v3132_v0, 0 }
  0x68   : > { %v450_v4 = vshrl.u32 %v449_v2, 23  ;;  %v453_v5 = vand.u32 8388607, %v446_v1  ;;  %v347_v10 = vshrl.u32 %v346_v7, 23  ;;  %v350_v11 = vand.u32 8388607, %v343_v6 }
  0x69   : > { %v3153_v23 = vshrl.u32 %v552_v16, 23  ;;  %v2915_v31 = vmov 2102212464   ;;  %v2916_v33 = vmov 920167782   ;;  %vm345_vm15 = vcmp.lt.s32.totalorder %v3137_v3, 0 }
  0x6a   : > { %v2406_v8 = vadd.s32 4294967169, %v450_v4  ;;  %v454_v13 = vor.u32 8388608, %v453_v5  ;;  %v2402_v14 = vadd.s32 4294967169, %v347_v10  ;;  %v351_v15 = vor.u32 8388608, %v350_v11  ;;  %s2919_s20 = smov 126   ;;  %s2920_s22 = smov 110  }
  0x6b   : > { %v2917_v40 = vmov 1326507024   ;;  %vm3239_vm14 = vcmp.le.f32.partialorder %v446_v1, 0.7853982  ;;  %s2924_s21 = smov 109   ;;  %s2925_s27 = smov 108  }
  0x6c   : > { %v456_v12 = vadd.s32 1, %v2406_v8  ;;  %v353_v18 = vadd.s32 1, %v2402_v14  ;;  %v3149_v21 = vshll.u32 %v454_v13, 8  ;;  %v3151_v22 = vshll.u32 %v351_v15, 8  ;;  %s2926_s29 = smov 92   ;;  %s2927_s30 = smov 91  }
  0x6d   : > { %s2928_s4 = smov 90   ;;  %s2262_s5 = sld [smem:[#allocation2]] }
  0x6e   : > { %vm457_vm0 = vcmp.gt.s32.totalorder %v456_v12, 0  ;;  %vm354_vm1 = vcmp.gt.s32.totalorder %v353_v18, 0  ;;  %s2457_s6 = sld [smem:[#allocation2 + $0x1]]  ;;  %s2625_s9 = smul.u32 24, %s3117_s17 }
  0x6f   : > { %v458_v17 = vsel %vm457_vm0, %v456_v12, 0  ;;  %v355_v45 = vsel %vm354_vm1, %v353_v18, 0  ;;  %s2642_s23 = smul.u32 384, %s2972_s16  ;;  %s2280_s16 = scalar_lea.sflag [#allocation4], %s3117_s17 }
  0x70   : > { %v459_v19 = vshrl.u32 %v458_v17, 5  ;;  %v460_v20 = vand.u32 31, %v458_v17  ;;  %v356_v48 = vshrl.u32 %v355_v45, 5  ;;  %v357_v49 = vand.u32 31, %v355_v45  ;;  %s213_s10 = scalar_lea.vmem [#allocation9], %s2625_s9  ;;  %p3947_p9 = scmp.ne.s32.totalorder %s3934_s8, 0 }
  0x71   : > { %s2294_s11 = sshll.u32 %s213_s10, 4  ;;  %s3880_s11 = int_to_ptr.vmem [resolvable:$true] %s2294_s11 }
  0x72   : > { %v461_v24 = vsub.s32 32, %v460_v20  ;;  %v463_v26 = vshll.u32 %v2912_v25, %v460_v20  ;;  %v466_v28 = vshll.u32 %v2913_v27, %v460_v20  ;;  %v469_v30 = vshll.u32 %v2914_v29, %v460_v20 }
  0x73   : > { %v472_v32 = vshll.u32 %v2915_v31, %v460_v20  ;;  %v475_v34 = vshll.u32 %v2916_v33, %v460_v20  ;;  %vm478_vm2 = vcmp.lt.s32.totalorder %v459_v19, 1  ;;  %vm479_vm3 = vcmp.lt.s32.totalorder %v459_v19, 2 }
  0x74   : > { %v462_v35 = vshrl.u32 %v2912_v25, %v461_v24  ;;  %v464_v36 = vshrl.u32 %v2913_v27, %v461_v24  ;;  %v467_v37 = vshrl.u32 %v2914_v29, %v461_v24  ;;  %v470_v38 = vshrl.u32 %v2915_v31, %v461_v24 }
  0x75   : > { %v473_v39 = vshrl.u32 %v2916_v33, %v461_v24  ;;  %v476_v41 = vshrl.u32 %v2917_v40, %v461_v24  ;;  %vm480_vm4 = vcmp.lt.s32.totalorder %v459_v19, 3  ;;  %vm481_vm5 = vcmp.lt.s32.totalorder %v459_v19, 4 }
  0x76   : > { %v465_v42 = vor.u32 %v464_v36, %v463_v26  ;;  %v468_v43 = vor.u32 %v467_v37, %v466_v28  ;;  %v471_v44 = vor.u32 %v470_v38, %v469_v30  ;;  %v358_v57 = vsub.s32 32, %v357_v49 }
  0x77   : > { %v474_v46 = vor.u32 %v473_v39, %v472_v32  ;;  %v477_v47 = vor.u32 %v476_v41, %v475_v34  ;;  %v360_v61 = vshll.u32 %v2912_v25, %v357_v49  ;;  %v363_v12 = vshll.u32 %v2913_v27, %v357_v49 }
  0x78   : > { %v482_v50 = vsel %vm478_vm2, %v462_v35, %v465_v42  ;;  %v483_v51 = vsel %vm481_vm5, %v471_v44, 2102212464  ;;  %v486_v52 = vsel %vm478_vm2, %v465_v42, %v468_v43  ;;  %v490_v53 = vsel %vm478_vm2, %v468_v43, %v471_v44 }
  0x79   : > { %v484_v54 = vsel %vm480_vm4, %v468_v43, %v483_v51  ;;  %v487_v55 = vsel %vm481_vm5, %v474_v46, 920167782  ;;  %v491_v56 = vsel %vm481_vm5, %v477_v47, 1326507024  ;;  %v359_v4 = vshrl.u32 %v2912_v25, %v358_v57 }
  0x7a   : > { %v485_v58 = vsel %vm479_vm3, %v482_v50, %v484_v54  ;;  %v488_v59 = vsel %vm480_vm4, %v471_v44, %v487_v55  ;;  %v492_v60 = vsel %vm480_vm4, %v474_v46, %v491_v56  ;;  %v361_v11 = vshrl.u32 %v2913_v27, %v358_v57 }
  0x7b   : > { %v489_v62 = vsel %vm479_vm3, %v486_v52, %v488_v59  ;;  %v493_v63 = vsel %vm479_vm3, %v490_v53, %v492_v60  ;;  %v501_v2 = vmul.u32 %v3149_v21, %v485_v58  ;;  %v364_v13 = vshrl.u32 %v2914_v29, %v358_v57 }
  0x7c   : > { %v3180_v5 = vmul.u32.u64.low %v3149_v21, %v493_v63  ;;  %v3181_v7 = vmul.u32.u64.high %v3149_v21, %v493_v63, %v3180_v5  ;;  %v3184_v8 = vmul.u32.u64.low %v3149_v21, %v489_v62  ;;  %v3185_v10 = vmul.u32.u64.high %v3149_v21, %v489_v62, %v3184_v8 }
  0x7d   : > { %v366_v14 = vshll.u32 %v2914_v29, %v357_v49  ;;  %v367_v15 = vshrl.u32 %v2915_v31, %v358_v57  ;;  %v369_v16 = vshll.u32 %v2915_v31, %v357_v49  ;;  %v370_v17 = vshrl.u32 %v2916_v33, %v358_v57 }
  0x7e   : > { %v372_v18 = vshll.u32 %v2916_v33, %v357_v49  ;;  %v362_v19 = vor.u32 %v361_v11, %v360_v61  ;;  %v365_v20 = vor.u32 %v364_v13, %v363_v12  ;;  %v373_v21 = vshrl.u32 %v2917_v40, %v358_v57  ;;  %v3218_v57 = vld [vmem:[%s3121_s28] sm:$0xff] }
  0x7f   : > { %vm375_vm6 = vcmp.lt.s32.totalorder %v356_v48, 1  ;;  %vm503_vm7 = vc.u32 %v3181_v7, %v3184_v8  ;;  %v504_v24 = vadd.s32 1, %v3185_v10  ;;  %v368_v26 = vor.u32 %v367_v15, %v366_v14 }
  0x80   : > { %v2410_v28 = vadd.s32 4294967169, %v3153_v23  ;;  %v371_v30 = vor.u32 %v370_v17, %v369_v16  ;;  %v374_v32 = vor.u32 %v373_v21, %v372_v18  ;;  %vm376_vm8 = vcmp.lt.s32.totalorder %v356_v48, 2 }
  0x81   : > { %vm377_vm9 = vcmp.lt.s32.totalorder %v356_v48, 3  ;;  %v505_v34 = vsel %vm503_vm7, %v504_v24, %v3185_v10  ;;  %vm378_vm10 = vcmp.lt.s32.totalorder %v356_v48, 4  ;;  %v379_v35 = vsel %vm375_vm6, %v359_v4, %v362_v19 }
  0x82   : > { %v383_v36 = vsel %vm375_vm6, %v362_v19, %v365_v20  ;;  %v506_v37 = vadd.s32 %v505_v34, %v501_v2  ;;  %v380_v38 = vsel %vm378_vm10, %v368_v26, 2102212464  ;;  %v384_v39 = vsel %vm378_vm10, %v371_v30, 920167782 }
  0x83   : > { %v387_v41 = vsel %vm375_vm6, %v365_v20, %v368_v26  ;;  %v381_v42 = vsel %vm377_vm9, %v365_v20, %v380_v38  ;;  %v385_v43 = vsel %vm377_vm9, %v368_v26, %v384_v39  ;;  %v388_v23 = vsel %vm378_vm10, %v374_v32, 1326507024 }
  0x84   : > { %v559_v44 = vadd.s32 1, %v2410_v28  ;;  %v507_v45 = vadd.s32 536870912, %v506_v37  ;;  %v386_v46 = vsel %vm376_vm8, %v383_v36, %v385_v43  ;;  %v389_v47 = vsel %vm377_vm9, %v371_v30, %v388_v23 }
  0x85   : > { %v549_v49 = vand.u32 2147483647, %v3144_v9  ;;  %v382_v50 = vsel %vm376_vm8, %v379_v35, %v381_v42  ;;  %v390_v51 = vsel %vm376_vm8, %v387_v41, %v389_v47  ;;  %v652_v58 = vlaneseq }
  0x86   : > { %v3210_v52 = vmul.u32.u64.low %v3151_v22, %v386_v46  ;;  %v3211_v53 = vmul.u32.u64.high %v3151_v22, %v386_v46, %v3210_v52  ;;  %v508_v54 = vshrl.u32 %v507_v45, 30  ;;  %vm560_vm11 = vcmp.gt.s32.totalorder %v559_v44, 0 }
  0x87   : > { %v3214_v55 = vmul.u32.u64.low %v3151_v22, %v390_v51  ;;  %v3215_v56 = vmul.u32.u64.high %v3151_v22, %v390_v51, %v3214_v55  ;;  %v561_v59 = vsel %vm560_vm11, %v559_v44, 0  ;;  %v398_v61 = vmul.u32 %v3151_v22, %v382_v50 }
  0x88   : > { %v509_v60 = vshll.u32 %v508_v54, 30  ;;  %v556_v48 = vand.u32 8388607, %v549_v49  ;;  %v563_v62 = vand.u32 31, %v561_v59  ;;  %v401_v63 = vadd.s32 1, %v3211_v53 }
  0x89   : > { %v243_v2 = vand.u32 2139095040, %v3218_v57  ;;  %v532_v5 = vsub.s32 4, %v508_v54  ;;  %vm400_vm12 = vc.u32 %v3215_v56, %v3210_v52  ;;  %v240_v10 = vand.u32 2147483647, %v3218_v57 }
  0x8a   : > { %v510_v4 = vsub.s32 %v506_v37, %v509_v60  ;;  %v3227_v11 = vshrl.u32 %v652_v58, 7  ;;  %v402_v12 = vsel %vm400_vm12, %v401_v63, %v3211_v53  ;;  %v557_v14 = vor.u32 8388608, %v556_v48 }
  0x8b   : > { %v403_v22 = vadd.s32 %v402_v12, %v398_v61  ;;  %v564_v15 = vsub.s32 32, %v563_v62  ;;  %v244_v16 = vshrl.u32 %v243_v2, 23  ;;  %v533_v18 = vsel %vm448_vm13, %v532_v5, %v508_v54 }
  0x8c   : > { %v512_v13 = vsub.s32 0, %v510_v4  ;;  %v3235_v19 = vand.u32 8388607, %v240_v10  ;;  %v502_v21 = vadd.s32 %v3184_v8, %v3181_v7  ;;  %v3246_v24 = vsub.s32 4, %v3227_v11 }
  0x8d   : > { %v404_v26 = vadd.s32 536870912, %v403_v22  ;;  %v566_v30 = vshll.u32 %v2912_v25, %v563_v62  ;;  %v567_v32 = vshrl.u32 %v2913_v27, %v564_v15  ;;  %v3250_v34 = vshll.u32 %v557_v14, 8 }
  0x8e   : > { %v2407_v17 = vmin.u32 %v512_v13, %v510_v4  ;;  %v535_v1 = vsel %vm3239_vm14, 0, %v533_v18  ;;  %v3254_v36 = vshrl.u32 %v561_v59, 5  ;;  %v2398_v37 = vadd.s32 4294967169, %v244_v16 }
  0x8f   : > { %v405_v35 = vshrl.u32 %v404_v26, 30  ;;  %v3257_v7 = vadd.s32 %v3210_v52, %v3215_v56  ;;  %v569_v8 = vshll.u32 %v2913_v27, %v563_v62  ;;  %v248_v39 = vor.u32 8388608, %v3235_v19 }
  0x90   : > { %v514_v28 = vclz %v2407_v17  ;;  %v570_v42 = vshrl.u32 %v2914_v29, %v564_v15  ;;  %v575_v43 = vshll.u32 %v2915_v31, %v563_v62  ;;  %v576_v23 = vshrl.u32 %v2916_v33, %v564_v15 }
  0x91   : > { %v406_v41 = vshll.u32 %v405_v35, 30  ;;  %v3265_v44 = vand.u32 3, %v535_v1  ;;  %v568_v45 = vor.u32 %v567_v32, %v566_v30  ;;  %v572_v46 = vshll.u32 %v2914_v29, %v563_v62 }
  0x92   : > { %v2408_v38 = vadd.s32 4294967294, %v514_v28  ;;  %v573_v51 = vshrl.u32 %v2915_v31, %v564_v15  ;;  %v578_v52 = vshll.u32 %v2916_v33, %v563_v62  ;;  %v579_v56 = vshrl.u32 %v2917_v40, %v564_v15 }
  0x93   : > { %v3268_v50 = vsub.s32 %v403_v22, %v406_v41  ;;  %v429_v59 = vsub.s32 4, %v405_v35  ;;  %v571_v60 = vor.u32 %v570_v42, %v569_v8  ;;  %v577_v61 = vor.u32 %v576_v23, %v575_v43 }
  0x94   : > { %vm2409_vm0 = vcmp.lt.s32.totalorder %v2408_v38, 0  ;;  %vm581_vm1 = vcmp.lt.s32.totalorder %v3254_v36, 1  ;;  %vm584_vm2 = vcmp.lt.s32.totalorder %v3254_v36, 4  ;;  %v565_v62 = vshrl.u32 %v2912_v25, %v564_v15 }
  0x95   : > { %v517_v47 = vsel %vm2409_vm0, 0, %v2408_v38  ;;  %v409_v58 = vsub.s32 0, %v3268_v50  ;;  %v574_v5 = vor.u32 %v573_v51, %v572_v46  ;;  %vm582_vm3 = vcmp.lt.s32.totalorder %v3254_v36, 2 }
  0x96   : > { %v518_v53 = vsub.s32 32, %v517_v47  ;;  %v519_v54 = vshll.u32 %v510_v4, %v517_v47  ;;  %v522_v55 = vsub.s32 4294967266, %v517_v47  ;;  %v580_v13 = vor.u32 %v579_v56, %v578_v52 }
  0x97   : > { %v2403_v2 = vmin.u32 %v409_v58, %v3268_v50  ;;  %vm583_vm4 = vcmp.lt.s32.totalorder %v3254_v36, 3  ;;  %v586_v14 = vsel %vm584_vm2, %v574_v5, 2102212464  ;;  %v589_v16 = vsel %vm581_vm1, %v568_v45, %v571_v60 }
  0x98   : > { %v520_v48 = vshrl.u32 %v502_v21, %v518_v53  ;;  %v523_v63 = vadd.s32 127, %v522_v55  ;;  %v590_v17 = vsel %vm584_vm2, %v577_v61, 920167782  ;;  %v973_v21 = vadd.s32 3, %v535_v1 }
  0x99   : > { %v411_v22 = vclz %v2403_v2  ;;  %vm3288_vm5 = vcmp.le.f32.partialorder %v343_v6, 0.7853982  ;;  %v430_v28 = vsel %vm345_vm15, %v429_v59, %v405_v35  ;;  %v585_v32 = vsel %vm581_vm1, %v565_v62, %v568_v45 }
  0x9a   : > { %v521_v4 = vor.u32 %v520_v48, %v519_v54  ;;  %v524_v12 = vshll.u32 %v523_v63, 23  ;;  %v591_v38 = vsel %vm583_vm4, %v574_v5, %v590_v17  ;;  %v593_v8 = vsel %vm581_vm1, %v571_v60, %v574_v5 }
  0x9b   : > { %v2404_v30 = vadd.s32 4294967294, %v411_v22  ;;  %v587_v6 = vsel %vm583_vm4, %v571_v60, %v586_v14  ;;  %v592_v41 = vsel %vm582_vm3, %v589_v16, %v591_v38  ;;  %v594_v35 = vsel %vm584_vm2, %v580_v13, 1326507024 }
  0x9c   : > { %v525_v18 = vor.u32 4788187, %v524_v12  ;;  %v528_v15 = vcvt.s32.f32 %v521_v4  ;;  %v595_v42 = vsel %vm583_vm4, %v577_v61, %v594_v35  ;;  %v250_v51 = vadd.s32 1, %v2398_v37 }
  0x9d   : > { %vm2405_vm6 = vcmp.lt.s32.totalorder %v2404_v30, 0  ;;  %v3309_v43 = vmul.u32.u64.low %v3250_v34, %v592_v41  ;;  %v3310_v23 = vmul.u32.u64.high %v3250_v34, %v592_v41, %v3309_v43  ;;  %v596_v47 = vsel %vm582_vm3, %v593_v8, %v595_v42 }
  0x9e   : > { %v526_v1 = vand.u32 2147483647, %v525_v18  ;;  %v414_v46 = vsel %vm2405_vm6, 0, %v2404_v30  ;;  %v588_v55 = vsel %vm582_vm3, %v585_v32, %v587_v6  ;;  %vm251_vm7 = vcmp.gt.s32.totalorder %v250_v51, 0 }
  0x9f   : > { %v415_v52 = vsub.s32 32, %v414_v46  ;;  %v416_v53 = vshll.u32 %v3268_v50, %v414_v46  ;;  %v419_v54 = vsub.s32 4294967266, %v414_v46  ;;  %v607_v48 = vadd.s32 1, %v3310_v23 }
  0xa0   : > { %v529_v45 = vmul.f32 %v528_v15, %v526_v1  ;;  %v3319_v58 = vmul.u32.u64.low %v3250_v34, %v596_v47  ;;  %v3320_v59 = vmul.u32.u64.high %v3250_v34, %v596_v47, %v3319_v58  ;;  %v252_v63 = vsel %vm251_vm7, %v250_v51, 0 }
  0xa1   : > { %v417_v60 = vshrl.u32 %v3257_v7, %v415_v52  ;;  %v420_v61 = vadd.s32 127, %v419_v54  ;;  %v3326_v50 = vand.u32 3, %v973_v21  ;;  %v604_v36 = vmul.u32 %v3250_v34, %v588_v55 }
  0xa2   : > { %v530_v56 = vxor.u32 2147483648, %v529_v45  ;;  %v254_v2 = vand.u32 31, %v252_v63  ;;  %v432_v7 = vsel %vm3288_vm5, 0, %v430_v28  ;;  %vm606_vm8 = vc.u32 %v3320_v59, %v3309_v43 }
  0xa3   : > { %v418_v5 = vor.u32 %v417_v60, %v416_v53  ;;  %v421_v4 = vshll.u32 %v420_v61, 23  ;;  %v3336_v12 = vshrl.u32 %v252_v63, 5  ;;  %v608_v14 = vsel %vm606_vm8, %v607_v48, %v3310_v23 }
  0xa4   : > { %v531_v37 = vsel %vm448_vm13, %v530_v56, %v529_v45  ;;  %v255_v13 = vsub.s32 32, %v254_v2  ;;  %vm544_vm9 = vcmp.eq.s32.totalorder %v3265_v44, 2  ;;  %vm979_vm10 = vcmp.eq.s32.totalorder %v3326_v50, 2 }
  0xa5   : > { %v534_v62 = vsel %vm3239_vm14, %v3132_v0, %v531_v37  ;;  %v422_v22 = vor.u32 4788187, %v421_v4  ;;  %v425_v34 = vcvt.s32.f32 %v418_v5  ;;  %v609_v20 = vadd.s32 %v608_v14, %v604_v36 }
  0xa6   : > { %2730 = vcosq.f32 %v534_v62  ;;  %v256_v16 = vshrl.u32 %v2912_v25, %v255_v13  ;;  %v257_v17 = vshll.u32 %v2912_v25, %v254_v2  ;;  %v258_v18 = vshrl.u32 %v2913_v27, %v255_v13 }
  0xa7   : > { %2732 = vsinq.f32 %v534_v62  ;;  %vm541_vm11 = vcmp.eq.s32.totalorder %v3265_v44, 0  ;;  %vm976_vm12 = vcmp.eq.s32.totalorder %v3326_v50, 0  ;;  %v423_v15 = vand.u32 2147483647, %v422_v22 }
  0xa8   : > { %v260_v21 = vshll.u32 %v2913_v27, %v254_v2  ;;  %v261_v28 = vshrl.u32 %v2914_v29, %v255_v13  ;;  %v263_v30 = vshll.u32 %v2914_v29, %v254_v2  ;;  %vm540_vm13 = vcmp.lt.s32.totalorder %v3265_v44, 2 }
  0xa9   : > { %v610_v32 = vadd.s32 536870912, %v609_v20  ;;  %v259_v38 = vor.u32 %v258_v18, %v257_v17  ;;  %v264_v8 = vshrl.u32 %v2915_v31, %v255_v13  ;;  %v266_v25 = vshll.u32 %v2915_v31, %v254_v2 }
  0xaa   : > { %vm538_vm14 = vweird.f32 %v3132_v0  ;;  %v426_v1 = vmul.f32 %v425_v34, %v423_v15  ;;  %v262_v6 = vor.u32 %v261_v28, %v260_v21  ;;  %v267_v41 = vshrl.u32 %v2916_v33, %v255_v13 }
  0xab   : > { %v3355_v27 = vshll.u32 %v2916_v33, %v254_v2  ;;  %v3357_v35 = vshrl.u32 %v610_v32, 30  ;;  %v265_v29 = vor.u32 %v264_v8, %v263_v30  ;;  %v270_v42 = vshrl.u32 %v2917_v40, %v255_v13 }
  0xac   : > { %vm272_vm0 = vcmp.lt.s32.totalorder %v3336_v12, 1  ;;  %v427_v23 = vxor.u32 2147483648, %v426_v1  ;;  %v3361_v45 = vand.u32 3, %v432_v7  ;;  %v869_v31 = vadd.s32 3, %v432_v7 }
  0xad   : > { %v268_v46 = vor.u32 %v267_v41, %v266_v25  ;;  %v612_v47 = vshll.u32 %v3357_v35, 30  ;;  %v271_v51 = vor.u32 %v270_v42, %v3355_v27  ;;  %vm274_vm1 = vcmp.lt.s32.totalorder %v3336_v12, 3 }
  0xae   : > { %vm275_vm2 = vcmp.lt.s32.totalorder %v3336_v12, 4  ;;  %v428_v33 = vsel %vm345_vm15, %v427_v23, %v426_v1  ;;  %v276_v40 = vsel %vm272_vm0, %v256_v16, %v259_v38  ;;  %v280_v53 = vsel %vm272_vm0, %v259_v38, %v262_v6 }
  0xaf   : > { %v277_v52 = vsel %vm275_vm2, %v265_v29, 2102212464  ;;  %v431_v55 = vsel %vm3288_vm5, %v3137_v3, %v428_v33  ;;  %v3378_v56 = vsub.s32 %v609_v20, %v612_v47  ;;  %vm273_vm3 = vcmp.lt.s32.totalorder %v3336_v12, 2 }
  0xb0   : > { %v2731_v54 = vpop.eup %2730  ;;  %v278_v58 = vsel %vm274_vm1, %v262_v6, %v277_v52  ;;  %2734 = vcosq.f32 %v431_v55  ;;  %v3383_v48 = vand.u32 3, %v869_v31  ;;  %vm975_vm15 = vcmp.lt.s32.totalorder %v3326_v50, 2 }
  0xb1   : > { %v2733_v60 = vpop.eup %2732  ;;  %v545_v61 = vxor.u32 2147483648, %v2731_v54  ;;  %v3387_v63 = vsel %vm273_vm3, %v276_v40, %v278_v58  ;;  %2736 = vsinq.f32 %v431_v55  ;;  %v615_v26 = vsub.s32 0, %v3378_v56 }
  0xb2   : > { %v542_v37 = vxor.u32 2147483648, %v2733_v60  ;;  %v3395_v2 = vrot.slane %v3132_v0, %v3246_v24  ;;  %v3401_v5 = vrot.slane %v3137_v3, %v3246_v24  ;;  %vm1160_vm4 = vcmask 1043456  }
  0xb3   : > { %v546_v36 = vsel %vm544_vm9, %v545_v61, %v2733_v60  ;;  %v981_v62 = vsel %vm979_vm10, %v545_v61, %v2733_v60  ;;  %vm438_vm5 = vcmp.eq.s32.totalorder %v3361_v45, 0  ;;  %v2411_v13 = vmin.u32 %v615_v26, %v3378_v56 }
  0xb4   : > { %v543_v4 = vsel %vm541_vm11, %v2731_v54, %v542_v37  ;;  %v978_v7 = vsel %vm976_vm12, %v2731_v54, %v542_v37  ;;  %v281_v22 = vsel %vm275_vm2, %v268_v46, 920167782  ;;  %vm437_vm6 = vcmp.lt.s32.totalorder %v3361_v45, 2 }
  0xb5   : > { %v547_v34 = vsel %vm540_vm13, %v543_v4, %v546_v36  ;;  %v982_v14 = vsel %vm975_vm15, %v978_v7, %v981_v62  ;;  %vm441_vm7 = vcmp.eq.s32.totalorder %v3361_v45, 2  ;;  %vm871_vm8 = vcmp.lt.s32.totalorder %v3383_v48, 2 }
  0xb6   : > { %v548_v50 = vsel %vm538_vm14, nan, %v547_v34  ;;  %v983_v20 = vsel %vm538_vm14, nan, %v982_v14  ;;  %vm435_vm9 = vweird.f32 %v3137_v3  ;;  %v617_v16 = vclz %v2411_v13 }
  0xb7   : > { %v3423_v44 = vshll.u32 %v248_v39, 8  ;;  %v3426_v17 = vmul.f32 %v3395_v2, %v548_v50  ;;  %v1090_v18 = vmul.f32 %v983_v20, %v3395_v2  ;;  %v282_v15 = vsel %vm274_vm1, %v265_v29, %v281_v22 }
  0xb8   : > { %v284_v21 = vsel %vm272_vm0, %v262_v6, %v265_v29  ;;  %vm872_vm10 = vcmp.eq.s32.totalorder %v3383_v48, 0  ;;  %vm875_vm11 = vcmp.eq.s32.totalorder %v3383_v48, 2  ;;  %v605_v19 = vadd.s32 %v3309_v43, %v3320_v59 }
  0xb9   : > { %v2412_v39 = vadd.s32 4294967294, %v617_v16  ;;  %v3438_v28 = vmul.f32 2.0, %v3426_v17  ;;  %v635_v30 = vsub.s32 4, %v3357_v35  ;;  %v283_v32 = vsel %vm273_vm3, %v280_v53, %v282_v15 }
  0xba   : > { %v285_v38 = vsel %vm275_vm2, %v271_v51, 1326507024  ;;  %v3448_v25 = vmul.u32.u64.low %v3423_v44, %v283_v32  ;;  %v3449_v1 = vmul.u32.u64.high %v3423_v44, %v283_v32, %v3448_v25  ;;  %v2735_v43 = vpop.eup %2734  ;;  %v225_v27 = vmul.f32 0.70710677, %v3137_v3 }
  0xbb   : > { %vm2413_vm12 = vcmp.lt.s32.totalorder %v2412_v39, 0  ;;  %v286_v8 = vsel %vm274_vm1, %v268_v46, %v285_v38  ;;  %v1106_v59 = vmul.f32 %v3438_v28, %v1090_v18  ;;  %v2737_v29 = vpop.eup %2736  ;;  %v442_v42 = vxor.u32 2147483648, %v2735_v43 }
  0xbc   : > { %v620_v6 = vsel %vm2413_vm12, 0, %v2412_v39  ;;  %v287_v41 = vsel %vm273_vm3, %v284_v21, %v286_v8  ;;  %v439_v33 = vxor.u32 2147483648, %v2737_v29  ;;  %2738 = verf.f32 %v225_v27 }
  0xbd   : > { %v621_v23 = vsub.s32 32, %v620_v6  ;;  %v622_v31 = vshll.u32 %v3378_v56, %v620_v6  ;;  %v625_v46 = vsub.s32 4294967266, %v620_v6  ;;  %v1118_v47 = vmul.f32 %v1106_v59, %v3438_v28 }
  0xbe   : > { %v1154_v51 = vrot.slane %v1106_v59, 4  ;;  %v443_v40 = vsel %vm441_vm7, %v442_v42, %v2737_v29  ;;  %v877_v12 = vsel %vm875_vm11, %v442_v42, %v2737_v29  ;;  %v440_v56 = vsel %vm438_vm5, %v2735_v43, %v439_v33 }
  0xbf   : > { %v623_v52 = vshrl.u32 %v605_v19, %v621_v23  ;;  %v626_v53 = vadd.s32 127, %v625_v46  ;;  %v3462_v54 = vsub.f32 %v1118_v47, %v1090_v18  ;;  %v874_v58 = vsel %vm872_vm10, %v2735_v43, %v439_v33 }
  0xc0   : > { %v3465_v55 = vsel %vm1160_vm4, %v1090_v18, %v1154_v51  ;;  %v444_v60 = vsel %vm437_vm6, %v440_v56, %v443_v40  ;;  %v878_v61 = vsel %vm871_vm8, %v874_v58, %v877_v12  ;;  %vm551_vm13 = vcmp.lt.s32.totalorder %v3144_v9, 0 }
  0xc1   : > { %v624_v37 = vor.u32 %v623_v52, %v622_v31  ;;  %v627_v26 = vshll.u32 %v626_v53, 23  ;;  %v1175_v36 = vsel %vm1160_vm4, %v3462_v54, 0.0  ;;  %v445_v62 = vsel %vm435_vm9, nan, %v444_v60 }
  0xc2   : > { %v879_v4 = vsel %vm435_vm9, nan, %v878_v61  ;;  %v3483_v7 = vpack.c.bf16 %v1175_v36, %v3465_v55  ;;  %v669_v45 = vmul.f32 %v3401_v5, %v445_v62  ;;  %v636_v34 = vsel %vm551_vm13, %v635_v30, %v3357_v35 }
  0xc3   : > { %v1089_v48 = vmul.f32 %v879_v4, %v3401_v5  ;;  %v628_v13 = vor.u32 4788187, %v627_v26  ;;  %v631_v22 = vcvt.s32.f32 %v624_v37  ;;  %v298_v18 = vadd.s32 1, %v3449_v1 }
  0xc4   : > { %v3491_v14 = vmul.u32.u64.low %v3423_v44, %v287_v41  ;;  %v3492_v50 = vmul.u32.u64.high %v3423_v44, %v287_v41, %v3491_v14  ;;  %1208 = vrot.lane.b32.xlu1 %v3483_v7, %s2918_s18  ;;  %v1093_v20 = vmul.f32 2.0, %v669_v45  ;;  %v226_v15 = vmul.f32 0.70710677, %v3132_v0 }
  0xc5   : > { %v629_v16 = vand.u32 2147483647, %v628_v13  ;;  %vm3500_vm14 = vcmp.le.f32.partialorder %v549_v49, 0.7853982  ;;  %v295_v35 = vmul.u32 %v3423_v44, %v3387_v63  ;;  %v220_v19 = vmul.f32 0.5, %v3137_v3 }
  0xc6   : > { %v1098_v39 = vmul.f32 %v3438_v28, %v3426_v17  ;;  %v1105_v30 = vmul.f32 %v1093_v20, %v1089_v48  ;;  %v1097_v38 = vmul.f32 %v1093_v20, %v669_v45  ;;  %2740 = verf.f32 %v226_v15  ;;  %v2739_v8 = vpop.eup %2738 }
  0xc7   : > { %v632_v32 = vmul.f32 %v631_v22, %v629_v16  ;;  %v638_v43 = vsel %vm3500_vm14, 0, %v636_v34  ;;  %v3513_v49 = vadd.s32 %v3448_v25, %v3492_v50  ;;  %vm297_vm0 = vc.u32 %v3492_v50, %v3448_v25 }
  0xc8   : > { %v1102_v3 = vsub.f32 %v1098_v39, %v3395_v2  ;;  %v1117_v63 = vmul.f32 %v1105_v30, %v1093_v20  ;;  %v1153_v44 = vrot.slane %v1105_v30, 4  ;;  %v299_v6 = vsel %vm297_vm0, %v298_v18, %v3449_v1 }
  0xc9   : > { %v633_v59 = vxor.u32 2147483648, %v632_v32  ;;  %v300_v41 = vadd.s32 %v299_v6, %v295_v35  ;;  %v233_v27 = vadd.f32 1.0, %v2739_v8  ;;  %v1101_v29 = vsub.f32 %v1097_v38, %v3401_v5 }
  0xca   : > { %v1110_v42 = vmul.f32 %v1102_v3, %v3438_v28  ;;  %v3521_v23 = vsub.f32 %v1117_v63, %v1089_v48  ;;  %v3524_v31 = vsel %vm1160_vm4, %v1089_v48, %v1153_v44  ;;  %v1129_v2 = vrot.slane %v669_v45, 4 }
  0xcb   : > { %v634_v25 = vsel %vm551_vm13, %v633_v59, %v632_v32  ;;  %v301_v1 = vadd.s32 536870912, %v300_v41  ;;  %v237_v47 = vmul.f32 %v233_v27, %v220_v19  ;;  %v1109_v51 = vmul.f32 %v1101_v29, %v1093_v20 }
  0xcc   : > { %v637_v46 = vsel %vm3500_vm14, %v3144_v9, %v634_v25  ;;  %v1174_v5 = vsel %vm1160_vm4, %v3521_v23, 0.0  ;;  %v1114_v28 = vsub.f32 %v1110_v42, %v3426_v17  ;;  %v1077_v52 = vadd.s32 3, %v638_v43 }
  0xcd   : > { %2742 = vcosq.f32 %v637_v46  ;;  %v3535_v33 = vpack.c.bf16 %v1174_v5, %v3524_v31  ;;  %v3537_v40 = vshrl.u32 %v301_v1, 30  ;;  %v1113_v12 = vsub.f32 %v1109_v51, %v669_v45 }
  0xce   : > { %2744 = vsinq.f32 %v637_v46  ;;  %v1142_v53 = vrot.slane %v1114_v28, 4  ;;  %v1162_v60 = vsel %vm1160_vm4, %v237_v47, %v1129_v2  ;;  %v221_v61 = vmul.f32 0.5, %v3132_v0 }
  0xcf   : > { %1206 = vrot.lane.b32.xlu0 %v3535_v33, %s2918_s18  ;;  %v303_v56 = vshll.u32 %v3537_v40, 30  ;;  %v1141_v58 = vrot.slane %v1113_v12, 4  ;;  %v642_v45 = vand.u32 3, %v638_v43  ;;  %v1078_v48 = vand.u32 3, %v1077_v52 }
  0xd0   : > { %v2741_v37 = vpop.eup %2740  ;;  %v1167_v26 = vsel %vm1160_vm4, %v1102_v3, %v1142_v53  ;;  %v1130_v22 = vrot.slane %v3426_v17, 4  ;;  %vm641_vm5 = vweird.f32 %v3144_v9  ;;  %v3555_v19 = vrot.slane %v3144_v9, %v3246_v24 }
  0xd1   : > { %v304_v36 = vsub.s32 %v300_v41, %v303_v56  ;;  %v1166_v62 = vsel %vm1160_vm4, %v1101_v29, %v1141_v58  ;;  %v234_v4 = vadd.f32 1.0, %v2741_v37  ;;  %vm644_vm1 = vcmp.eq.s32.totalorder %v642_v45, 0 }
  0xd2   : > { %v3546_v13 = vpack.c.bf16 %v1166_v62, %v1162_v60  ;;  %vm647_vm2 = vcmp.eq.s32.totalorder %v642_v45, 2  ;;  %vm1083_vm3 = vcmp.eq.s32.totalorder %v1078_v48, 2  ;;  %vm1080_vm15 = vcmp.eq.s32.totalorder %v1078_v48, 0 }
  0xd3   : > { %v306_v34 = vsub.s32 0, %v304_v36  ;;  %v238_v14 = vmul.f32 %v234_v4, %v221_v61  ;;  %vm643_vm6 = vcmp.lt.s32.totalorder %v642_v45, 2  ;;  %vm1079_vm7 = vcmp.lt.s32.totalorder %v1078_v48, 2 }
  0xd4   : > { %v326_v58 = vsub.s32 4, %v3537_v40  ;;  %vm242_vm9 = vcmp.lt.s32.totalorder %v3218_v57, 0  ;;  %vm241_vm10 = vcmp.le.f32.partialorder %v240_v10, 0.7853982  ;;  %v224_v48 = vmul.f32 0.70710677, %v3218_v57 }
  0xd5   : > { %v2399_v50 = vmin.u32 %v306_v34, %v304_v36  ;;  %v1163_v0 = vsel %vm1160_vm4, %v238_v14, %v1130_v22  ;;  %v227_v10 = vmul.f32 0.70710677, %v3144_v9 }
  0xd6   : > { %v3550_v21 = vpack.c.bf16 %v1167_v26, %v1163_v0  ;;  %v327_v26 = vsel %vm242_vm9, %v326_v58, %v3537_v40 }
  0xd7   : > { %v2743_v20 = vpop.eup %2742  ;;  %v308_v15 = vclz %v2399_v50  ;;  %v329_v4 = vsel %vm241_vm10, 0, %v327_v26 }
  0xd8   : > { %v2745_v16 = vpop.eup %2744  ;;  %v648_v18 = vxor.u32 2147483648, %v2743_v20  ;;  %v765_v45 = vadd.s32 3, %v329_v4  ;;  %v333_v22 = vand.u32 3, %v329_v4 }
  0xd9   : > { %v645_v35 = vxor.u32 2147483648, %v2745_v16  ;;  %v2400_v30 = vadd.s32 4294967294, %v308_v15 }
  0xda   : > { %v649_v17 = vsel %vm647_vm2, %v648_v18, %v2745_v16  ;;  %v1085_v39 = vsel %vm1083_vm3, %v648_v18, %v2745_v16  ;;  %v766_v40 = vand.u32 3, %v765_v45  ;;  %vm338_vm11 = vcmp.eq.s32.totalorder %v333_v22, 2 }
  0xdb   : > { %v646_v32 = vsel %vm644_vm1, %v2743_v20, %v645_v35  ;;  %v1082_v38 = vsel %vm1080_vm15, %v2743_v20, %v645_v35  ;;  %vm2401_vm8 = vcmp.lt.s32.totalorder %v2400_v30, 0  ;;  %vm335_vm13 = vcmp.eq.s32.totalorder %v333_v22, 0 }
  0xdc   : > { %v650_v8 = vsel %vm643_vm6, %v646_v32, %v649_v17  ;;  %v1086_v43 = vsel %vm1079_vm7, %v1082_v38, %v1085_v39  ;;  %v311_v44 = vsel %vm2401_vm8, 0, %v2400_v30  ;;  %vm771_vm12 = vcmp.eq.s32.totalorder %v766_v40, 2 }
  0xdd   : > { %v651_v3 = vsel %vm641_vm5, nan, %v650_v8  ;;  %v1087_v63 = vsel %vm641_vm5, nan, %v1086_v43  ;;  %v312_v41 = vsub.s32 32, %v311_v44  ;;  %v313_v27 = vshll.u32 %v304_v36, %v311_v44 }
  0xde   : > { %v3559_v59 = vmul.f32 %v3555_v19, %v651_v3  ;;  %v1091_v6 = vmul.f32 %v1087_v63, %v3555_v19  ;;  %v316_v29 = vsub.s32 4294967266, %v311_v44  ;;  %vm768_vm14 = vcmp.eq.s32.totalorder %v766_v40, 0 }
  0xdf   : > { %v314_v25 = vshrl.u32 %v3513_v49, %v312_v41  ;;  %vm334_vm0 = vcmp.lt.s32.totalorder %v333_v22, 2  ;;  %vm767_vm1 = vcmp.lt.s32.totalorder %v766_v40, 2  ;;  %vm332_vm2 = vweird.f32 %v3218_v57 }
  0xe0   : > { %v3563_v42 = vmul.f32 2.0, %v3559_v59  ;;  %v317_v2 = vadd.s32 127, %v316_v29  ;;  %v655_v16 = vrot.slane %v3218_v57, %v3246_v24  ;;  %v219_v41 = vmul.f32 0.5, %v3218_v57 }
  0xe1   : > { %v315_v1 = vor.u32 %v314_v25, %v313_v27  ;;  %v2756_v25 = vld [vmem:[%s3121_s28 + $0x18] sm:$0xff]  ;;  %v1131_v58 = vrot.slane %v3559_v59, 4  ;;  %vm2923_vm3 = vmmov 0   ;;  %vm1212_vm15 = vcmask 1039360  }
  0xe2   : > { %v1107_v46 = vmul.f32 %v3563_v42, %v1091_v6  ;;  %v318_v47 = vshll.u32 %v317_v2, 23  ;;  %v1099_v20 = vmul.f32 %v3563_v42, %v3559_v59  ;;  %v222_v2 = vmul.f32 0.5, %v2756_v25 }
  0xe3   : > { %v322_v12 = vcvt.s32.f32 %v315_v1  ;;  %vm1225_vm5 = vcmask 261120   ;;  %vm2929_vm6 = vmmov 1   ;;  %vm1530_vm8 = vcmask 900096  }
  0xe4   : > { %v1119_v51 = vmul.f32 %v1107_v46, %v3563_v42  ;;  %v1155_v5 = vrot.slane %v1107_v46, 4  ;;  %v319_v28 = vor.u32 4788187, %v318_v47  ;;  %v1103_v30 = vsub.f32 %v1099_v20, %v3555_v19  ;;  %vm2432_vm7 = vmpackc.low %vm1160_vm4, %vm2929_vm6 }
  0xe6   : > { %v1123_v52 = vsub.f32 %v1119_v51, %v1091_v6  ;;  %v1172_v53 = vsel %vm1160_vm4, %v1091_v6, %v1155_v5  ;;  %v320_v56 = vand.u32 2147483647, %v319_v28  ;;  %v1111_v6 = vmul.f32 %v1103_v30, %v3563_v42 }
  0xe8   : > { %v1176_v60 = vsel %vm1160_vm4, %v1123_v52, 0.0  ;;  %v323_v49 = vmul.f32 %v322_v12, %v320_v56  ;;  %v1115_v51 = vsub.f32 %v1111_v6, %v3559_v59 }
  0xe9   : > { %v3571_v61 = vpack.c.bf16 %v1176_v60, %v1172_v53 }
  0xea   : > { %v324_v37 = vxor.u32 2147483648, %v323_v49  ;;  %v1143_v60 = vrot.slane %v1115_v51, 4 }
  0xeb   : > { %1210 = vrot.lane.b32.xlu1 %v3571_v61, %s2918_s18 }
  0xec   : > { %v325_v36 = vsel %vm242_vm9, %v324_v37, %v323_v49  ;;  %v1168_v4 = vsel %vm1160_vm4, %v1103_v30, %v1143_v60  ;;  %vm1648_vm9 = vcmask 891904  }
  0xed   : > { %v328_v62 = vsel %vm241_vm10, %v3218_v57, %v325_v36  ;;  %vm1766_vm10 = vcmask 883712  }
  0xee   : > { %2746 = vcosq.f32 %v328_v62 }
  0xef   : > { %1408 = vrot.lane.b32.xlu1 %v3483_v7, %s2919_s20  ;;  %2748 = vsinq.f32 %v328_v62 }
  0xf0   : > { %2750 = verf.f32 %v224_v48  ;;  %v2921_v48 = vmov 0.0  }
  0xf1   : > { %2752 = verf.f32 %v227_v10  ;;  %2489 = vmatprep.subr.bf16.mxu1 %v2921_v48  ;;  %v2922_v10 = vmov 0   ;;  %2493 = vmatprep.mubr.msk.bf16.mxu1 %vm2923_vm3, %v2921_v48 }
  0xf2   : > { %1261 = vmatprep.mubr.bf16.mxu0 %v2922_v10 }
  0xf3   : > { %1410 = vrot.lane.b32.xlu1 %v3571_v61, %s2919_s20 }
  0xf7   : > { %1526 = vrot.lane.b32.xlu1 %v3483_v7, %s2920_s22 }
  0xf8   : > { %v2747_v34 = vpop.eup %2746 }
  0xf9   : > { %v2749_v14 = vpop.eup %2748  ;;  %v339_v50 = vxor.u32 2147483648, %v2747_v34 }
  0xfa   : > { %v336_v9 = vxor.u32 2147483648, %v2749_v14  ;;  %v2751_v8 = vpop.eup %2750 }
  0xfb   : > { %v340_v0 = vsel %vm338_vm11, %v339_v50, %v2749_v14  ;;  %v773_v18 = vsel %vm771_vm12, %v339_v50, %v2749_v14  ;;  %v2753_v63 = vpop.eup %2752  ;;  %v232_v24 = vadd.f32 1.0, %v2751_v8  ;;  %vm1884_vm11 = vcmask 752640  }
  0xfc   : > { %v337_v15 = vsel %vm335_vm13, %v2747_v34, %v336_v9  ;;  %v770_v35 = vsel %vm768_vm14, %v2747_v34, %v336_v9  ;;  %v235_v46 = vadd.f32 1.0, %v2753_v63  ;;  %vm2002_vm12 = vcmask 744448  }
  0xfd   : > { %v341_v17 = vsel %vm334_vm0, %v337_v15, %v340_v0  ;;  %v774_v39 = vsel %vm767_vm1, %v770_v35, %v773_v18  ;;  %v236_v5 = vmul.f32 %v232_v24, %v219_v41  ;;  %v2433_v24 = vpack.c.bf16 %v3521_v23, %v3524_v31  ;;  %v1185_v31 = vld [vmem:[#allocation7] sm:$0xf] }
  0xfe   : > { %v342_v32 = vsel %vm332_vm2, nan, %v341_v17  ;;  %v775_v38 = vsel %vm332_vm2, nan, %v774_v39  ;;  %v239_v57 = vmul.f32 %v235_v46, %v222_v2  ;;  %vm2120_vm13 = vcmask 736256  }
  0xff   : > { %v668_v43 = vmul.f32 %v655_v16, %v342_v32  ;;  %v1088_v3 = vmul.f32 %v775_v38, %v655_v16  ;;  %vm2261_vm14 = vcmp.lt.s32.totalorder %v3227_v11, 4 }
 0x100   : > { %v1164_v62 = vsel %vm1160_vm4, %v239_v57, %v1131_v58 }
 0x101   : > { %v1092_v44 = vmul.f32 2.0, %v668_v43  ;;  %v1128_v52 = vrot.slane %v668_v43, 4  ;;  %v1180_v59 = vpack.c.bf16 %v1168_v4, %v1164_v62  ;;  %v1513_v4 = vld [vmem:[#allocation7 + $0xc] sm:$0xf] }
 0x103   : > { %v1104_v27 = vmul.f32 %v1092_v44, %v1088_v3  ;;  %v1096_v29 = vmul.f32 %v1092_v44, %v668_v43  ;;  %v1161_v26 = vsel %vm1160_vm4, %v236_v5, %v1128_v52 }
 0x105   : > { %v1116_v1 = vmul.f32 %v1104_v27, %v1092_v44  ;;  %v1152_v47 = vrot.slane %v1104_v27, 4  ;;  %v1100_v19 = vsub.f32 %v1096_v29, %v655_v16  ;;  %v2440_v27 = vpack.c.bf16 %v3462_v54, %v3465_v55 }
 0x107   : > { %v3598_v28 = vsub.f32 %v1116_v1, %v1088_v3  ;;  %v3601_v12 = vsel %vm1160_vm4, %v1088_v3, %v1152_v47  ;;  %v1108_v42 = vmul.f32 %v1100_v19, %v1092_v44  ;;  %v1187_v44 = vld [vmem:[#allocation7 + $0x4] sm:$0xf] }
 0x109   : > { %v1173_v53 = vsel %vm1160_vm4, %v3598_v28, 0.0  ;;  %v1112_v56 = vsub.f32 %v1108_v42, %v668_v43  ;;  %v2436_v22 = vpack.c.bf16 %v3598_v28, %v3601_v12 }
 0x10a   : > { %v3607_v49 = vpack.c.bf16 %v1173_v53, %v3601_v12  ;;  %v1395_v12 = vld [vmem:[#allocation7 + $0x8] sm:$0xf] }
 0x10b   : > { %v1140_v37 = vrot.slane %v1112_v56, 4 }
 0x10c   : > { %1204 = vrot.lane.b32.xlu0 %v3607_v49, %s2918_s18 }
 0x10d   : > { %v1165_v36 = vsel %vm1160_vm4, %v1100_v19, %v1140_v37  ;;  %vm1412_vm4 = vcmask 1031168  }
 0x10e   : > { %v3615_v45 = vpack.c.bf16 %v1165_v36, %v1161_v26 }
 0x110   : > { %1406 = vrot.lane.b32.xlu0 %v3535_v33, %s2919_s20  ;;  %1196 = vrot.lane.b32.xlu1 %v3615_v45, %s2918_s18 }
 0x114   : > { %1404 = vrot.lane.b32.xlu0 %v3607_v49, %s2919_s20  ;;  %1202 = vrot.lane.b32.xlu1 %v1180_v59, %s2918_s18 }
 0x118   : > { %1198 = vrot.lane.b32.xlu0 %v3546_v13, %s2918_s18  ;;  %1528 = vrot.lane.b32.xlu1 %v3571_v61, %s2920_s22 }
 0x11c   : > { %1200 = vrot.lane.b32.xlu0 %v3550_v21, %s2918_s18  ;;  %1644 = vrot.lane.b32.xlu1 %v3483_v7, %s2924_s21  ;;  %s2831_s18 = scalar_lea.vmem %s3880_s11, 384 }
 0x11d   : > { %p2832_p11 = scmp.ne.s32.totalorder %s3880_s11, %s2831_s18 }
 0x11f   : > { %p2833_p13 = pnand %p2832_p11, %p3947_p9 }
 0x120   : > { %1524 = vrot.lane.b32.xlu0 %v3535_v33, %s2920_s22  ;;  %1646 = vrot.lane.b32.xlu1 %v3571_v61, %s2924_s21 }
 0x121   : > { %p2834_p3 = pneg %p2833_p13 }
 0x124   : > { %1522 = vrot.lane.b32.xlu0 %v3607_v49, %s2920_s22  ;;  %1762 = vrot.lane.b32.xlu1 %v3483_v7, %s2925_s27 }
 0x128   : > { %1642 = vrot.lane.b32.xlu0 %v3535_v33, %s2924_s21  ;;  %1400 = vrot.lane.b32.xlu1 %v3550_v21, %s2919_s20 }
 0x12c   : > { %1640 = vrot.lane.b32.xlu0 %v3607_v49, %s2924_s21  ;;  %1402 = vrot.lane.b32.xlu1 %v1180_v59, %s2919_s20 }
 0x130   : > { %1760 = vrot.lane.b32.xlu0 %v3535_v33, %s2925_s27  ;;  %1764 = vrot.lane.b32.xlu1 %v3571_v61, %s2925_s27 }
 0x134   : > { %1398 = vrot.lane.b32.xlu0 %v3546_v13, %s2919_s20  ;;  %1518 = vrot.lane.b32.xlu1 %v3550_v21, %s2920_s22 }
 0x136   : > { %v1209_v40 = vpop.permute.xlu1 %1208 }
 0x138   : > { %1396 = vrot.lane.b32.xlu0 %v3615_v45, %s2919_s20  ;;  %1520 = vrot.lane.b32.xlu1 %v1180_v59, %s2920_s22  ;;  %s2930_s20 = smov [#allocation9]  }
 0x13c   : > { %1758 = vrot.lane.b32.xlu0 %v3607_v49, %s2925_s27  ;;  %1880 = vrot.lane.b32.xlu1 %v3483_v7, %s2926_s29 }
 0x140   : > { %1516 = vrot.lane.b32.xlu0 %v3546_v13, %s2920_s22  ;;  %1636 = vrot.lane.b32.xlu1 %v3550_v21, %s2924_s21 }
 0x141   : > { %v1207_v20 = vpop.permute.xlu0 %1206 }
 0x144   : > { %1514 = vrot.lane.b32.xlu0 %v3615_v45, %s2920_s22  ;;  %1638 = vrot.lane.b32.xlu1 %v1180_v59, %s2924_s21  ;;  %s2835_s22 = sshll.u32 %s2930_s20, 4  ;;  %s2836_s22 = int_to_ptr.vmem [resolvable:$false] %s2835_s22 }
 0x145   : > { %p2838_p5 = scmp.lt.s32.totalorder %s3880_s11, %s2836_s22 }
 0x148   : > { %1878 = vrot.lane.b32.xlu0 %v3535_v33, %s2926_s29  ;;  %1882 = vrot.lane.b32.xlu1 %v3571_v61, %s2926_s29 }
 0x14c   : > { %1634 = vrot.lane.b32.xlu0 %v3546_v13, %s2924_s21  ;;  %1754 = vrot.lane.b32.xlu1 %v3550_v21, %s2925_s27 }
 0x150   : > { %1632 = vrot.lane.b32.xlu0 %v3615_v45, %s2924_s21  ;;  %1756 = vrot.lane.b32.xlu1 %v1180_v59, %s2925_s27  ;;  %s2837_s21 = scalar_lea.vmem %s2836_s22, 768 }
 0x151   : > { %p2839_p10 = scmp.lt.s32.totalorder %s2837_s21, %s2831_s18 }
 0x153   : > { %p2840_p1 = por %p2839_p10, %p2838_p5 }
 0x154   : > { %1876 = vrot.lane.b32.xlu0 %v3607_v49, %s2926_s29  ;;  %1872 = vrot.lane.b32.xlu1 %v3550_v21, %s2926_s29 }
 0x155   : > { %p2841_p2 = pnand %p2840_p1, %p2834_p3 }
 0x158   : > { %1752 = vrot.lane.b32.xlu0 %v3546_v13, %s2925_s27  ;;  %1874 = vrot.lane.b32.xlu1 %v1180_v59, %s2926_s29 }
 0x15c   : > { %1750 = vrot.lane.b32.xlu0 %v3615_v45, %s2925_s27  ;;  %1990 = vrot.lane.b32.xlu1 %v3550_v21, %s2927_s30 }
 0x15d   : > { %v1211_v34 = vpop.permute.xlu1 %1210 }
 0x15e   : > { %v1218_v3 = vsel %vm1212_vm15, %v1209_v40, %v1211_v34 }
 0x160   : > { %1870 = vrot.lane.b32.xlu0 %v3546_v13, %s2926_s29  ;;  %1992 = vrot.lane.b32.xlu1 %v1180_v59, %s2927_s30 }
 0x161   : > { %v3682_v14 = vpop.permute.xlu1 %1408 }
 0x164   : > { %1868 = vrot.lane.b32.xlu0 %v3615_v45, %s2926_s29  ;;  %1998 = vrot.lane.b32.xlu1 %v3483_v7, %s2927_s30 }
 0x165   : > { %v3686_v50 = vpop.permute.xlu1 %1410 }
 0x166   : > { %v1418_v1 = vsel %vm1412_vm4, %v3682_v14, %v3686_v50 }
 0x168   : > { %1988 = vrot.lane.b32.xlu0 %v3546_v13, %s2927_s30  ;;  %2000 = vrot.lane.b32.xlu1 %v3571_v61, %s2927_s30 }
 0x169   : > { %v3691_v9 = vpop.permute.xlu1 %1526 }
 0x16c   : > { %1986 = vrot.lane.b32.xlu0 %v3615_v45, %s2927_s30  ;;  %2108 = vrot.lane.b32.xlu1 %v3550_v21, %s2928_s4 }
 0x170   : > { %1996 = vrot.lane.b32.xlu0 %v3535_v33, %s2927_s30  ;;  %2110 = vrot.lane.b32.xlu1 %v1180_v59, %s2928_s4 }
 0x174   : > { %1994 = vrot.lane.b32.xlu0 %v3607_v49, %s2927_s30  ;;  %2116 = vrot.lane.b32.xlu1 %v3483_v7, %s2928_s4 }
 0x178   : > { %2106 = vrot.lane.b32.xlu0 %v3546_v13, %s2928_s4  ;;  %2118 = vrot.lane.b32.xlu1 %v3571_v61, %s2928_s4 }
 0x17c   : > { %2104 = vrot.lane.b32.xlu0 %v3615_v45, %s2928_s4 }
 0x17e   : > { %v1205_v0 = vpop.permute.xlu0 %1204 }
 0x17f   : > { %v1216_v63 = vsel %vm1212_vm15, %v1205_v0, %v1207_v20 }
 0x180   : > { %2114 = vrot.lane.b32.xlu0 %v3535_v33, %s2928_s4  ;;  %v1217_v33 = vsel %vm1212_vm15, %v1207_v20, %v1209_v40 }
 0x182   : > { %v3694_v16 = vpop.permute.xlu0 %1406  ;;  %v1197_v18 = vpop.permute.xlu1 %1196 }
 0x183   : > { %v1417_v28 = vsel %vm1412_vm4, %v3694_v16, %v3682_v14 }
 0x184   : > { %2112 = vrot.lane.b32.xlu0 %v3607_v49, %s2928_s4 }
 0x186   : > { %v3697_v7 = vpop.permute.xlu0 %1404  ;;  %v1203_v15 = vpop.permute.xlu1 %1202 }
 0x187   : > { %v1416_v53 = vsel %vm1412_vm4, %v3697_v7, %v3694_v16  ;;  %v1631_v7 = vld [vmem:[#allocation7 + $0x10] sm:$0xf] }
 0x18a   : > { %v1199_v35 = vpop.permute.xlu0 %1198  ;;  %v3699_v17 = vpop.permute.xlu1 %1528 }
 0x18b   : > { %v1213_v39 = vsel %vm1212_vm15, %v1197_v18, %v1199_v35  ;;  %v1536_v60 = vsel %vm1530_vm8, %v3691_v9, %v3699_v17 }
 0x18e   : > { %v1201_v61 = vpop.permute.xlu0 %1200  ;;  %v3701_v30 = vpop.permute.xlu1 %1644 }
 0x18f   : > { %v1214_v32 = vsel %vm1212_vm15, %v1199_v35, %v1201_v61  ;;  %v1215_v38 = vsel %vm1212_vm15, %v1201_v61, %v1203_v15 }
 0x190   : > { %1229 = vmatprep.subr.bf16.mxu0 %v1214_v32  ;;  %2490 = vmatpush3.bf16.msra.mxu1 %v1215_v38 }
 0x191   : > { %1230 = vmatpush1.bf16.msra.mxu0 %v1213_v39  ;;  %2491 = vmatprep.subr.bf16.mxu1 %v2921_v48 }
 0x192   : > { %v3704_v8 = vpop.permute.xlu0 %1524  ;;  %1231 = vmatprep.subr.bf16.mxu0 %v1217_v33  ;;  %v3706_v43 = vpop.permute.xlu1 %1646 }
 0x193   : > { %v1535_v62 = vsel %vm1530_vm8, %v3704_v8, %v3691_v9  ;;  %v1654_v50 = vsel %vm1648_vm9, %v3701_v30, %v3706_v43 }
 0x194   : > { %2492 = vmatpush3.bf16.msra.mxu1 %v1218_v3 }
 0x195   : > { %1232 = vmatpush1.bf16.msra.mxu0 %v1216_v63  ;;  %2497 = vmatprep.subr.bf16.mxu1 %v2921_v48  ;;  %v1749_v63 = vld [vmem:[#allocation7 + $0x14] sm:$0xf] }
 0x196   : > { %v3709_v6 = vpop.permute.xlu0 %1522  ;;  %1313 = vmatprep.subr.bf16.mxu0 %v3546_v13  ;;  %v3712_v41 = vpop.permute.xlu1 %1762 }
 0x197   : > { %2494 = vmatmul.mubr.msk.bf16.vlgmr.msra.gmra.mrb[0].mxu1 %vm1225_vm5, %v1187_v44  ;;  %v1534_v40 = vsel %vm1530_vm8, %v3709_v6, %v3704_v8 }
 0x198   : > { %2430 = vmatmul.mubr.msk.bf16.vlgmr.msra.gmra.mrb[0].mxu0 %vm1225_vm5, %v1187_v44  ;;  %2498 = vmatpush3.bf16.msra.mxu1 %v3550_v21 }
 0x199   : > { %1314 = vmatpush1.bf16.msra.mxu0 %v3615_v45  ;;  %2499 = vmatprep.subr.bf16.mxu1 %v2921_v48 }
 0x19a   : > { %v3724_v13 = vpop.permute.xlu0 %1642  ;;  %2434 = vmatprep.subr.msk.bf16.mxu0 %vm2432_vm7, %v2433_v24  ;;  %1345 = vmatprep.mubr.bf16.mxu0 %v2922_v10  ;;  %v1401_v23 = vpop.permute.xlu1 %1400 }
 0x19b   : > { %2501 = vmatprep.mubr.msk.bf16.mxu1 %vm2923_vm3, %v2921_v48  ;;  %v1653_v18 = vsel %vm1648_vm9, %v3724_v13, %v3701_v30 }
 0x19c   : > { %2500 = vmatpush3.bf16.msk.msra.mxu1 %vm2432_vm7, %v2440_v27 }
 0x19d   : > { %2437 = vmatpush1.bf16.msk.msra.mxu0 %vm2432_vm7, %v2436_v22  ;;  %2505 = vmatprep.subr.bf16.mxu1 %v2921_v48 }
 0x19e   : > { %v3733_v54 = vpop.permute.xlu0 %1640  ;;  %v1403_v55 = vpop.permute.xlu1 %1402 }
 0x19f   : > { %v1415_v21 = vsel %vm1412_vm4, %v1401_v23, %v1403_v55  ;;  %v1652_v61 = vsel %vm1648_vm9, %v3733_v54, %v3724_v13 }
 0x1a2   : > { %v3736_v29 = vpop.permute.xlu0 %1760  ;;  %v3738_v25 = vpop.permute.xlu1 %1764 }
 0x1a3   : > { %2502 = vmatmul.mubr.msk.bf16.vlgmr.msra.gmra.mrb[0].mxu1 %vm1225_vm5, %v1185_v31  ;;  %v1772_v32 = vsel %vm1766_vm10, %v3712_v41, %v3738_v25  ;;  %v1771_v3 = vsel %vm1766_vm10, %v3736_v29, %v3712_v41 }
 0x1a4   : > { %2438 = vmatmul.mubr.msk.bf16.vlgmr.msra.gmra.mrb[0].mxu0 %vm1225_vm5, %v1185_v31  ;;  %2506 = vmatpush3.bf16.msra.mxu1 %v1415_v21 }
 0x1a5   : > { %2507 = vmatprep.subr.bf16.mxu1 %v2921_v48  ;;  %1460 = vmatprep.mubr.bf16.mxu0 %v2922_v10 }
 0x1a6   : > { %v1399_v2 = vpop.permute.xlu0 %1398  ;;  %2509 = vmatprep.mubr.msk.bf16.mxu1 %vm2923_vm3, %v2921_v48  ;;  %v1519_v46 = vpop.permute.xlu1 %1518 }
 0x1a7   : > { %v1414_v47 = vsel %vm1412_vm4, %v1399_v2, %v1401_v23 }
 0x1a8   : > { %1428 = vmatprep.subr.bf16.mxu0 %v1414_v47  ;;  %2508 = vmatpush3.bf16.msra.mxu1 %v1418_v1 }
 0x1a9   : > { %2513 = vmatprep.subr.bf16.mxu1 %v2921_v48 }
 0x1aa   : > { %v1397_v19 = vpop.permute.xlu0 %1396  ;;  %v1521_v51 = vpop.permute.xlu1 %1520 }
 0x1ab   : > { %v1413_v5 = vsel %vm1412_vm4, %v1397_v19, %v1399_v2  ;;  %v1533_v42 = vsel %vm1530_vm8, %v1519_v46, %v1521_v51 }
 0x1ac   : > { %1429 = vmatpush1.bf16.msra.mxu0 %v1413_v5 }
 0x1ad   : > { %1430 = vmatprep.subr.bf16.mxu0 %v1417_v28 }
 0x1ae   : > { %v3756_v52 = vpop.permute.xlu0 %1758  ;;  %v3758_v57 = vpop.permute.xlu1 %1880 }
 0x1af   : > { %2510 = vmatmul.mubr.msk.bf16.vlgmr.msra.gmra.mrb[0].mxu1 %vm1225_vm5, %v1395_v12  ;;  %v1770_v27 = vsel %vm1766_vm10, %v3756_v52, %v3736_v29 }
 0x1b0   : > { %1431 = vmatpush1.bf16.msra.mxu0 %v1416_v53  ;;  %2514 = vmatpush3.bf16.msra.mxu1 %v1533_v42 }
 0x1b1   : > { %2515 = vmatprep.subr.bf16.mxu1 %v2921_v48  ;;  %2517 = vmatprep.mubr.msk.bf16.mxu1 %vm2923_vm3, %v2921_v48 }
 0x1b2   : > { %v1517_v56 = vpop.permute.xlu0 %1516  ;;  %v1637_v58 = vpop.permute.xlu1 %1636 }
 0x1b3   : > { %2443 = vmatmul.mubr.msk.bf16.vlgmr.msra.gmra.mrb[0].mxu0 %vm1225_vm5, %v1395_v12  ;;  %v1532_v49 = vsel %vm1530_vm8, %v1517_v56, %v1519_v46  ;;  %v1867_v46 = vld [vmem:[#allocation7 + $0x18] sm:$0xf] }
 0x1b4   : > { %1546 = vmatprep.subr.bf16.mxu0 %v1532_v49  ;;  %2516 = vmatpush3.bf16.msra.mxu1 %v1536_v60 }
 0x1b5   : > { %1578 = vmatprep.mubr.bf16.mxu0 %v2922_v10  ;;  %2521 = vmatprep.subr.bf16.mxu1 %v2921_v48 }
 0x1b6   : > { %v1515_v37 = vpop.permute.xlu0 %1514  ;;  %v1639_v26 = vpop.permute.xlu1 %1638 }
 0x1b7   : > { %v1531_v36 = vsel %vm1530_vm8, %v1515_v37, %v1517_v56  ;;  %v1651_v45 = vsel %vm1648_vm9, %v1637_v58, %v1639_v26  ;;  %v1985_v56 = vld [vmem:[#allocation7 + $0x1c] sm:$0xf] }
 0x1b8   : > { %1547 = vmatpush1.bf16.msra.mxu0 %v1531_v36 }
 0x1b9   : > { %1548 = vmatprep.subr.bf16.mxu0 %v1535_v62 }
 0x1ba   : > { %v3779_v59 = vpop.permute.xlu0 %1878  ;;  %v3781_v22 = vpop.permute.xlu1 %1882 }
 0x1bb   : > { %2518 = vmatmul.mubr.msk.bf16.vlgmr.msra.gmra.mrb[0].mxu1 %vm1225_vm5, %v1513_v4  ;;  %v1890_v54 = vsel %vm1884_vm11, %v3758_v57, %v3781_v22  ;;  %v1889_v31 = vsel %vm1884_vm11, %v3779_v59, %v3758_v57 }
 0x1bc   : > { %1549 = vmatpush1.bf16.msra.mxu0 %v1534_v40  ;;  %2522 = vmatpush3.bf16.msra.mxu1 %v1651_v45  ;;  %v2222_v40 = vsub.s32 5, %v3227_v11 }
 0x1bd   : > { %2523 = vmatprep.subr.bf16.mxu1 %v2921_v48  ;;  %2525 = vmatprep.mubr.msk.bf16.mxu1 %vm2923_vm3, %v2921_v48 }
 0x1be   : > { %v1635_v34 = vpop.permute.xlu0 %1634  ;;  %v1755_v14 = vpop.permute.xlu1 %1754 }
 0x1bf   : > { %2445 = vmatmul.mubr.msk.bf16.vlgmr.msra.gmra.mrb[0].mxu0 %vm1225_vm5, %v1513_v4  ;;  %v1650_v20 = vsel %vm1648_vm9, %v1635_v34, %v1637_v58 }
 0x1c0   : > { %1664 = vmatprep.subr.bf16.mxu0 %v1650_v20  ;;  %2524 = vmatpush3.bf16.msra.mxu1 %v1654_v50  ;;  %v2758_v20 = vld [vmem:[%s3121_s28 + $0x8] sm:$0xff] }
 0x1c1   : > { %1696 = vmatprep.mubr.bf16.mxu0 %v2922_v10  ;;  %2529 = vmatprep.subr.bf16.mxu1 %v2921_v48 }
 0x1c2   : > { %v1633_v9 = vpop.permute.xlu0 %1632  ;;  %v1757_v0 = vpop.permute.xlu1 %1756 }
 0x1c3   : > { %v1649_v16 = vsel %vm1648_vm9, %v1633_v9, %v1635_v34  ;;  %v1769_v15 = vsel %vm1766_vm10, %v1755_v14, %v1757_v0  ;;  %v2227_v9 = vrot.slane %v2758_v20, %v2222_v40 }
 0x1c4   : > { %1665 = vmatpush1.bf16.msra.mxu0 %v1649_v16 }
 0x1c5   : > { %1666 = vmatprep.subr.bf16.mxu0 %v1653_v18 }
 0x1c6   : > { %v1877_v35 = vpop.permute.xlu0 %1876  ;;  %v1873_v17 = vpop.permute.xlu1 %1872 }
 0x1c7   : > { %2526 = vmatmul.mubr.msk.bf16.vlgmr.msra.gmra.mrb[0].mxu1 %vm1225_vm5, %v1631_v7  ;;  %v1888_v25 = vsel %vm1884_vm11, %v1877_v35, %v3779_v59  ;;  %v2103_v59 = vld [vmem:[#allocation7 + $0x20] sm:$0xf] }
 0x1c8   : > { %1667 = vmatpush1.bf16.msra.mxu0 %v1652_v61  ;;  %2530 = vmatpush3.bf16.msra.mxu1 %v1769_v15 }
 0x1c9   : > { %2531 = vmatprep.subr.bf16.mxu1 %v2921_v48  ;;  %2533 = vmatprep.mubr.msk.bf16.mxu1 %vm2923_vm3, %v2921_v48 }
 0x1ca   : > { %v1753_v39 = vpop.permute.xlu0 %1752  ;;  %v1875_v30 = vpop.permute.xlu1 %1874 }
 0x1cb   : > { %2447 = vmatmul.mubr.msk.bf16.vlgmr.msra.gmra.mrb[0].mxu0 %vm1225_vm5, %v1631_v7  ;;  %v1768_v38 = vsel %vm1766_vm10, %v1753_v39, %v1755_v14  ;;  %v1887_v44 = vsel %vm1884_vm11, %v1873_v17, %v1875_v30  ;;  %v2757_v14 = vld [vmem:[%s3121_s28] sm:$0xff]  ;;  %v2759_v7 = vld [vmem:[%s3121_s28 + $0x10] sm:$0xff]  ;;  %s3878_s28 = scalar_lea.hbm %s3925_s3, %s2642_s23 }
 0x1cc   : > { %1782 = vmatprep.subr.bf16.mxu0 %v1768_v38  ;;  %2532 = vmatpush3.bf16.msra.mxu1 %v1772_v32  ;;  %v2223_v50 = vrot.slane %v2757_v14, %v2222_v40  ;;  %v2231_v15 = vrot.slane %v2759_v7, %v2222_v40 }
 0x1cd   : > { %1814 = vmatprep.mubr.bf16.mxu0 %v2922_v10  ;;  %2537 = vmatprep.subr.bf16.mxu1 %v2921_v48 }
 0x1ce   : > { %v1751_v33 = vpop.permute.xlu0 %1750  ;;  %v1991_v8 = vpop.permute.xlu1 %1990 }
 0x1cf   : > { %v1767_v43 = vsel %vm1766_vm10, %v1751_v33, %v1753_v39 }
 0x1d0   : > { %1783 = vmatpush1.bf16.msra.mxu0 %v1767_v43 }
 0x1d1   : > { %1784 = vmatprep.subr.bf16.mxu0 %v1771_v3 }
 0x1d2   : > { %v1871_v6 = vpop.permute.xlu0 %1870  ;;  %v1993_v24 = vpop.permute.xlu1 %1992 }
 0x1d3   : > { %v1886_v13 = vsel %vm1884_vm11, %v1871_v6, %v1873_v17  ;;  %2534 = vmatmul.mubr.msk.bf16.vlgmr.msra.gmra.mrb[0].mxu1 %vm1225_vm5, %v1749_v63  ;;  %v2005_v19 = vsel %vm2002_vm12, %v1991_v8, %v1993_v24 }
 0x1d4   : > { %1785 = vmatpush1.bf16.msra.mxu0 %v1770_v27  ;;  %2538 = vmatpush3.bf16.msra.mxu1 %v1887_v44 }
 0x1d5   : > { %1900 = vmatprep.subr.bf16.mxu0 %v1886_v13  ;;  %2539 = vmatprep.subr.bf16.mxu1 %v2921_v48 }
 0x1d6   : > { %v1869_v41 = vpop.permute.xlu0 %1868  ;;  %2541 = vmatprep.mubr.msk.bf16.mxu1 %vm2923_vm3, %v2921_v48  ;;  %v1999_v23 = vpop.permute.xlu1 %1998 }
 0x1d7   : > { %v1885_v55 = vsel %vm1884_vm11, %v1869_v41, %v1871_v6  ;;  %2449 = vmatmul.mubr.msk.bf16.vlgmr.msra.gmra.mrb[0].mxu0 %vm1225_vm5, %v1749_v63 }
 0x1d8   : > { %1901 = vmatpush1.bf16.msra.mxu0 %v1885_v55  ;;  %2540 = vmatpush3.bf16.msra.mxu1 %v1890_v54 }
 0x1d9   : > { %1902 = vmatprep.subr.bf16.mxu0 %v1889_v31  ;;  %1932 = vmatprep.mubr.bf16.mxu0 %v2922_v10 }
 0x1da   : > { %v1989_v21 = vpop.permute.xlu0 %1988  ;;  %2545 = vmatprep.subr.bf16.mxu1 %v2921_v48  ;;  %v2001_v29 = vpop.permute.xlu1 %2000 }
 0x1db   : > { %v2004_v2 = vsel %vm2002_vm12, %v1989_v21, %v1991_v8  ;;  %v2008_v51 = vsel %vm2002_vm12, %v1999_v23, %v2001_v29 }
 0x1dc   : > { %1903 = vmatpush1.bf16.msra.mxu0 %v1888_v25  ;;  %v2264_v25 = vstv %s2262_s5 }
 0x1dd   : > { %2018 = vmatprep.subr.bf16.mxu0 %v2004_v2  ;;  %v2265_v2 = vstv %s2457_s6 }
 0x1de   : > { %v1987_v1 = vpop.permute.xlu0 %1986  ;;  %v2109_v47 = vpop.permute.xlu1 %2108 }
 0x1df   : > { %2542 = vmatmul.mubr.msk.bf16.vlgmr.msra.gmra.mrb[0].mxu1 %vm1225_vm5, %v1867_v46  ;;  %v2003_v12 = vsel %vm2002_vm12, %v1987_v1, %v1989_v21  ;;  %v2266_v1 = vsel %vm2261_vm14, %v2264_v25, %v2265_v2 }
 0x1e0   : > { %2546 = vmatpush3.bf16.msra.mxu1 %v2005_v19  ;;  %2549 = vmatprep.mubr.msk.bf16.mxu1 %vm2923_vm3, %v2921_v48 }
 0x1e1   : > { %2547 = vmatprep.subr.bf16.mxu1 %v2921_v48 }
 0x1e2   : > { %v1997_v5 = vpop.permute.xlu0 %1996  ;;  %v2111_v28 = vpop.permute.xlu1 %2110 }
 0x1e3   : > { %2451 = vmatmul.mubr.msk.bf16.vlgmr.msra.gmra.mrb[0].mxu0 %vm1225_vm5, %v1867_v46  ;;  %v2007_v42 = vsel %vm2002_vm12, %v1997_v5, %v1999_v23  ;;  %v2123_v58 = vsel %vm2120_vm13, %v2109_v47, %v2111_v28 }
 0x1e4   : > { %2019 = vmatpush1.bf16.msra.mxu0 %v2003_v12  ;;  %2548 = vmatpush3.bf16.msra.mxu1 %v2008_v51 }
 0x1e5   : > { %2020 = vmatprep.subr.bf16.mxu0 %v2007_v42  ;;  %2050 = vmatprep.mubr.bf16.mxu0 %v2922_v10 }
 0x1e6   : > { %v1995_v52 = vpop.permute.xlu0 %1994  ;;  %2553 = vmatprep.subr.bf16.mxu1 %v2921_v48  ;;  %v2117_v57 = vpop.permute.xlu1 %2116 }
 0x1e7   : > { %v2006_v53 = vsel %vm2002_vm12, %v1995_v52, %v1997_v5 }
 0x1e8   : > { %2021 = vmatpush1.bf16.msra.mxu0 %v2006_v53 }
 0x1ea   : > { %v2107_v60 = vpop.permute.xlu0 %2106  ;;  %v2119_v49 = vpop.permute.xlu1 %2118 }
 0x1eb   : > { %v2122_v37 = vsel %vm2120_vm13, %v2107_v60, %v2109_v47  ;;  %2550 = vmatmul.mubr.msk.bf16.vlgmr.msra.gmra.mrb[0].mxu1 %vm1225_vm5, %v1985_v56  ;;  %v2126_v26 = vsel %vm2120_vm13, %v2117_v57, %v2119_v49 }
 0x1ec   : > { %2136 = vmatprep.subr.bf16.mxu0 %v2122_v37  ;;  %2554 = vmatpush3.bf16.msra.mxu1 %v2123_v58 }
 0x1ed   : > { %2555 = vmatprep.subr.bf16.mxu1 %v2921_v48  ;;  %2557 = vmatprep.mubr.msk.bf16.mxu1 %vm2923_vm3, %v2921_v48 }
 0x1ee   : > { %v2105_v36 = vpop.permute.xlu0 %2104 }
 0x1ef   : > { %v2121_v62 = vsel %vm2120_vm13, %v2105_v36, %v2107_v60  ;;  %2453 = vmatmul.mubr.msk.bf16.vlgmr.msra.gmra.mrb[0].mxu0 %vm1225_vm5, %v1985_v56 }
 0x1f0   : > { %2137 = vmatpush1.bf16.msra.mxu0 %v2121_v62  ;;  %2556 = vmatpush3.bf16.msra.mxu1 %v2126_v26 }
 0x1f1   : > { %2168 = vmatprep.mubr.bf16.mxu0 %v2922_v10 }
 0x1f2   : > { %v2115_v4 = vpop.permute.xlu0 %2114 }
 0x1f3   : > { %v2125_v45 = vsel %vm2120_vm13, %v2115_v4, %v2117_v57 }
 0x1f4   : > { %2138 = vmatprep.subr.bf16.mxu0 %v2125_v45 }
 0x1f6   : > { %v2113_v22 = vpop.permute.xlu0 %2112 }
 0x1f7   : > { %v2124_v48 = vsel %vm2120_vm13, %v2113_v22, %v2115_v4  ;;  %2558 = vmatmul.mubr.msk.bf16.vlgmr.msra.gmra.mrb[0].mxu1 %vm1225_vm5, %v2103_v59 }
 0x1f8   : > { %2139 = vmatpush1.bf16.msra.mxu0 %v2124_v48 }
 0x1fb   : > { %2455 = vmatmul.mubr.msk.bf16.vlgmr.msra.gmra.mrb[0].mxu0 %vm1225_vm5, %v2103_v59 }
 0x2ca   : > { %v2211_v34 = vpop.f32.mrb[0].mxu1 }
 0x2cb   : > { %v2559_v10 = vpop.f32.mrb[1].mxu1  ;;  %v2234_v32 = vmul.f32 %v2231_v15, %v2211_v34 }
 0x2cc   : > { %v2214_v0 = vpop.f32.mrb[2].mxu1 }
 0x2cd   : > { %v2560_v16 = vpop.f32.mrb[3].mxu1 }
 0x2ce   : > { %v2170_v18 = vpop.f32.mrb[0].mxu0 }
 0x2cf   : > { %v2232_v35 = vmul.f32 %v2223_v50, %v2170_v18  ;;  %v2172_v17 = vpop.f32.mrb[1].mxu0 }
 0x2d0   : > { %v2233_v61 = vmul.f32 %v2227_v9, %v2172_v17  ;;  %v2174_v39 = vpop.f32.mrb[2].mxu0 }
 0x2d1   : > { %v2175_v30 = vpop.f32.mrb[3].mxu0 }
 0x2d2   : > { %v2235_v38 = vadd.f32 %v2233_v61, %v2232_v35 }
 0x2d4   : > { %v2236_v33 = vadd.f32 %v2235_v38, %v2234_v32 }
 0x2d6   : > { %2237 = vadd.xlane.f32.xlu0 %v2236_v33 }
 0x363   : > { %v2238_v8 = vpop.xlane.xlu0 %2237 }
 0x364   : > { %v2239_v43 = vmul.f32 0.00390625, %v2238_v8 }
 0x366   : > { %v2240_v3 = vsub.f32 %v2170_v18, %v2239_v43  ;;  %v2241_v63 = vsub.f32 %v2172_v17, %v2239_v43  ;;  %v2242_v44 = vsub.f32 %v2211_v34, %v2239_v43 }
 0x368   : > { %v2243_v6 = vmul.f32 %v2240_v3, %v2223_v50  ;;  %v2244_v24 = vmul.f32 %v2241_v63, %v2227_v9  ;;  %v2245_v27 = vmul.f32 %v2242_v44, %v2231_v15 }
 0x36a   : > { %v2246_v13 = vmul.f32 %v2243_v6, %v2243_v6  ;;  %v2247_v41 = vmul.f32 %v2244_v24, %v2244_v24  ;;  %v2248_v23 = vmul.f32 %v2245_v27, %v2245_v27 }
 0x36c   : > { %v2249_v54 = vadd.f32 %v2247_v41, %v2246_v13 }
 0x36e   : > { %v2250_v55 = vadd.f32 %v2249_v54, %v2248_v23 }
 0x370   : > { %2251 = vadd.xlane.f32.xlu1 %v2250_v55 }
 0x3fd   : > { %v2252_v31 = vpop.xlane.xlu1 %2251 }
 0x3fe   : > { %v2253_v21 = vmul.f32 0.00390625, %v2252_v31 }
 0x400   : > { %v2254_v29 = vadd.f32 1e-05, %v2253_v21 }
 0x402   : > { %2754 = vrsqrt.f32 %v2254_v29 }
 0x40c   : > { %v2755_v46 = vpop.eup %2754 }
 0x40d   : > { %v2256_v47 = vmul.f32 %v2755_v46, %v2243_v6  ;;  %v2257_v19 = vmul.f32 %v2755_v46, %v2244_v24  ;;  %v2258_v51 = vmul.f32 %v2755_v46, %v2245_v27 }
 0x40f   : > { %vm2267_vm0 = vcmp.ge.f32.partialorder %v2256_v47, 0.0  ;;  %vm2268_vm1 = vcmp.ge.f32.partialorder %v2257_v19, 0.0  ;;  %vm2269_vm2 = vcmp.ge.f32.partialorder %v2258_v51, 0.0  ;;  %v2270_v5 = vmul.f32 %v2266_v1, %v2256_v47 }
 0x410   : > { %v2271_v28 = vmul.f32 %v2266_v1, %v2257_v19  ;;  %v2272_v12 = vmul.f32 %v2266_v1, %v2258_v51 }
 0x411   : > { %v2273_v42 = vsel %vm2267_vm0, %v2256_v47, %v2270_v5 }
 0x412   : > { %v2274_v11 = vsel %vm2268_vm1, %v2257_v19, %v2271_v28  ;;  %v2275_v52 = vsel %vm2269_vm2, %v2258_v51, %v2272_v12  ;;  %2276 = vst [vmem:[%s213_s10] sm:$0xff] %v2273_v42 }
 0x413   : > { %2277 = vst [vmem:[%s213_s10 + $0x8] sm:$0xff] %v2274_v11  ;;  %2278 = vst [vmem:[%s213_s10 + $0x10] sm:$0xff] %v2275_v52 }
 0x414   : > { %2844 = shalt.err (!%p2841_p2)
}
 0x415   : > { %s2845_s17 = scalar_lea.hbm %s3878_s28, 384  ;;  %s2849_s30 = scalar_lea.hbm %s3925_s3, 768 }
 0x416   : > { %p2846_p6 = scmp.ne.s32.totalorder %s3878_s28, %s2845_s17  ;;  %p2850_p4 = scmp.lt.u32.totalorder %s3878_s28, %s3925_s3 }
 0x417   : > { %p2851_p8 = scmp.lt.u32.totalorder %s2849_s30, %s2845_s17  ;;  %p2853_p11 = scmp.lt.u32.totalorder %s2845_s17, %s3878_s28 }
 0x418   : > { %p2847_p7 = pnand %p2846_p6, %p3947_p9 }
 0x419   : > { %p2852_p0 = por %p2851_p8, %p2850_p4 }
 0x41a   : > { %p2848_p12 = pneg %p2847_p7 }
 0x41b   : > { %p2854_p13 = por %p2853_p11, %p2852_p0 }
 0x41d   : > { %p2855_p3 = pnand %p2854_p13, %p2848_p12 }
 0x41f   : > { %2858 = shalt.err (!%p2855_p3)
}
 0x420   : > { %2653 = dma.vmem_to_hbm [thread:$0]  (%p3947_p9), %s3880_s11, 384, %s3878_s28, %s2280_s16  }
 0x421 PF: > { %s2306_s6 = sand.u32 1, %s2893_s12   ;;  %p3948_p5 = scmp.ne.s32.totalorder %s3930_s19, 0 }
 0x422   : > { %p3949_p10 = scmp.ge.s32.totalorder %s2905_s15, 2  ;;  %s2307_s9 = scalar_lea.sflag [#allocation4], %s2306_s6 }
 0x424   : > { %p2667_p1 = pnand %p3949_p10, %p3948_p5 }
 0x426   : > { %2888 = dma.done.wait (!%p2667_p1), %s2307_s9, 384  }
 0x427   : > { %2890 = vsyncadd (!%p2667_p1), %s2307_s9, 4294966912  ;;  %p18_p2 = scmp.ge.s32.totalorder %s3007_s24, 4   ;;  %s3950_s12 = smov %s2897_s13 }
 0x428   : > { %s3951_s13 = smov %s2901_s14  ;;  %s3952_s14 = smov %s3063_s7 }
 0x429   : > { %s3953_s15 = smov %s3007_s24  ;;  %20 = sbr.rel (!%p18_p2) target bundleno = 7 (0x7), region = 94 }
 0x430   :  { %2312 = vsyncpa [#allocation3], 1 }
 0x431   :  { %2314 = vsyncpa [#allocation3 + $0x1], 1 }
 0x432   :  { %2315 = vsyncpa [#allocation8], 1 }
 0x433   :  { %2316 = vsyncpa [#allocation4], 1 }
 0x434   :  { %2318 = vsyncpa [#allocation4 + $0x1], 1 }
 0x435   :  { %2319 = vsyncpa [#allocation5], 1 }
 0x436   :  { %2321 = vsyncpa [#allocation5 + $0x1], 1 }

</bundles_post_ra>
